<compile_context>
chip_gen: v5e
topology: v5e:2x2
jax: 0.10.0
libtpu: 0.0.40
codegen_flags: <defaults>
</compile_context>

<pallas_src>
import functools

import jax
import jax.numpy as jnp
from jax.experimental import pallas as pl
from jax.experimental.pallas import tpu as pltpu


# --------------------------------------------------------------------------------------
# Pallas kernels
# --------------------------------------------------------------------------------------

def _shift_lanes(v, off):
    """out[..., s] = v[..., s + off], zeros where s + off falls outside the lane range."""
    if off == 0:
        return v
    zeros = jnp.zeros(v.shape[:-1] + (abs(off),), v.dtype)
    if off > 0:
        return jnp.concatenate([v[..., off:], zeros], axis=-1)
    return jnp.concatenate([zeros, v[..., :off]], axis=-1)


def _backbone_pool_kernel(x_ref, wet_ref, be_ref, wd_ref, bd_ref, o_ref, *, W):
    """Fused MBConv (expand 1x1 + ReLU -> depthwise 3x3 + ReLU) + global average pool.

    One grid step handles TB images of one (op, view) pair.

    x_ref  : (TB, Cin, H*W)  f32   images in the original channel-first layout
    wet_ref: (Cmid, Cin)     bf16  expand 1x1 weight (pre-transposed)
    be_ref : (Cmid, 1)       f32
    wd_ref : (9, Cmid, 1)    f32   depthwise 3x3 weight, row = kh*3 + kw
    bd_ref : (Cmid, 1)       f32
    o_ref  : (TB, Cmid)      f32   pooled output (project 1x1 folded into the neck)
    """
    TB = x_ref.shape[0]
    HW = x_ref.shape[-1]

    # ---- expand 1x1 conv + bias + ReLU (bf16 MXU inputs, f32 accumulate) ----
    x = x_ref[...].astype(jnp.bfloat16)                      # in-kernel cast (no HBM pass)
    wet = wet_ref[...]                                       # (Cmid, Cin)
    hs = []
    for b in range(TB):                                      # static unroll, plain 2-D dots
        hs.append(jnp.dot(wet, x[b], preferred_element_type=jnp.float32))
    h = jnp.stack(hs, axis=0)                                # (TB, Cmid, HW), HW lane-dense
    h = jnp.maximum(h + be_ref[...], 0.0)

    # ---- depthwise 3x3 (padding=1) + bias + ReLU: lane shifts + boundary masks ----
    wd = wd_ref[...]                                         # (9, Cmid, 1), hoisted load
    lane = jax.lax.broadcasted_iota(jnp.int32, (1, 1, HW), 2)
    wpos = lane % W                                          # column index within a row
    acc = jnp.zeros_like(h)
    for kh in range(3):
        for kw in range(3):
            off = (kh - 1) * W + (kw - 1)
            tap = _shift_lanes(h, off)                       # vertical halo -> zeros
            if kw == 0:                                      # horizontal halo -> mask
                tap = jnp.where(wpos >= 1, tap, 0.0)
            elif kw == 2:
                tap = jnp.where(wpos < W - 1, tap, 0.0)
            acc = acc + tap * wd[kh * 3 + kw]
    acc = jnp.maximum(acc + bd_ref[...], 0.0)                # (TB, Cmid, HW)

    # ---- global average pool; project 1x1 is affine and has been folded downstream ----
    o_ref[...] = jnp.mean(acc, axis=-1).astype(o_ref.dtype)  # (TB, Cmid)


def _neck_kernel(x_ref, wf_ref, bf_ref, w2_ref, b2_ref, o_ref, *, normalize, inv_g):
    """Fused (project+linear1)+ReLU -> linear2, optional L2-normalize, mean over ops.

    Grid axis 0 runs over candidate ops; the output block is revisited (accumulator).
    """
    x = x_ref[...].astype(jnp.bfloat16)                               # (M, Cmid)
    h = jnp.dot(x, wf_ref[...], preferred_element_type=jnp.float32)
    h = jnp.maximum(h + bf_ref[...], 0.0)                             # (M, HID)
    z = jnp.dot(h.astype(jnp.bfloat16), w2_ref[...],
                preferred_element_type=jnp.float32) + b2_ref[...]     # (M, PROJ)
    if normalize:
        z = z * jax.lax.rsqrt(jnp.sum(z * z, axis=1, keepdims=True) + 1e-24)
    z = z * inv_g                                                     # contribution to mean

    @pl.when(pl.program_id(0) == 0)
    def _init():
        o_ref[...] = z.astype(o_ref.dtype)

    @pl.when(pl.program_id(0) != 0)
    def _acc():
        o_ref[...] = o_ref[...] + z.astype(o_ref.dtype)


def _head_loss_kernel(p_ref, t_ref, w1_ref, b1_ref, w2_ref, b2_ref, o_ref):
    """Fused predictor MLP + BYOL-style 2 - 2*cos loss (symmetric pair stacked along rows).

    Rows 0..N-1 are (pred(v1), target_v2); rows N..2N-1 are (pred(v2), target_v1), so
    loss_total = (2 - 2*mean_N cos1) + (2 - 2*mean_N cos2) = 4 - 4*mean_{2N} cos.
    """
    h = jnp.dot(p_ref[...].astype(w1_ref.dtype), w1_ref[...],
                preferred_element_type=jnp.float32)
    h = jnp.maximum(h + b1_ref[...], 0.0)
    q = jnp.dot(h.astype(w2_ref.dtype), w2_ref[...], preferred_element_type=jnp.float32)
    q = q + b2_ref[...]
    t = t_ref[...]
    qn = q * jax.lax.rsqrt(jnp.sum(q * q, axis=1, keepdims=True) + 1e-24)
    tn = t * jax.lax.rsqrt(jnp.sum(t * t, axis=1, keepdims=True) + 1e-24)
    cos = jnp.sum(qn * tn, axis=1, keepdims=True)                     # (2N, 1)
    o_ref[...] = (4.0 - 4.0 * jnp.mean(cos, keepdims=True)).astype(o_ref.dtype)


# --------------------------------------------------------------------------------------
# Kernel wrappers
# --------------------------------------------------------------------------------------

def _pick_tb(n, cap=16):
    """Largest divisor of n that is <= cap (images per grid step)."""
    for tb in range(min(n, cap), 0, -1):
        if n % tb == 0:
            return tb
    return 1


def backbone_pool(img, ops, view_index_fn):
    """img: (N, V, Cin, H, W) f32; ops: stacked per-op weights.  Returns (G, 2, N, Cmid) f32.

    view_index_fn(g, h) maps (op index, view half) -> view index into img's axis 1,
    using only grid-index arithmetic (no host-side gather/relayout of the images).
    """
    N, V, Cin, H, W = img.shape
    G, Cmid, _ = ops["wet"].shape
    HW = H * W
    x = img.reshape(N, V, Cin, HW)                       # free reshape (contiguous dims)
    TB = _pick_tb(N)
    nb = N // TB

    out = pl.pallas_call(
        functools.partial(_backbone_pool_kernel, W=W),
        grid=(G, 2, nb),
        in_specs=[
            pl.BlockSpec((TB, None, Cin, HW),
                         lambda g, h, b: (b, view_index_fn(g, h), 0, 0)),
            pl.BlockSpec((None, Cmid, Cin), lambda g, h, b: (g, 0, 0)),
            pl.BlockSpec((None, Cmid, 1), lambda g, h, b: (g, 0, 0)),
            pl.BlockSpec((None, 9, Cmid, 1), lambda g, h, b: (g, 0, 0, 0)),
            pl.BlockSpec((None, Cmid, 1), lambda g, h, b: (g, 0, 0)),
        ],
        out_specs=pl.BlockSpec((None, None, None, TB, Cmid),
                               lambda g, h, b: (g, h, b, 0, 0)),
        out_shape=jax.ShapeDtypeStruct((G, 2, nb, TB, Cmid), jnp.float32),
        compiler_params=pltpu.CompilerParams(
            dimension_semantics=("parallel", "parallel", "parallel"),
            vmem_limit_bytes=32 * 1024 * 1024),          # explicit; usage is well under this
    )(x, ops["wet"], ops["be"], ops["wd"], ops["bd"])
    return out.reshape(G, 2, N, Cmid)


def neck_apply_avg(pooled, wf, bf, w2, b2, *, normalize):
    """pooled: (G, M, Cmid) f32.  Fused (project-folded) MLP, optional L2-norm, mean over G.

    Returns (M, PROJ) f32: mean over the G candidate ops of the (normalized) projections.
    """
    G, M, Cmid = pooled.shape
    HID = wf.shape[-1]
    PROJ = w2.shape[-1]
    return pl.pallas_call(
        functools.partial(_neck_kernel, normalize=normalize, inv_g=1.0 / G),
        grid=(G,),
        in_specs=[
            pl.BlockSpec((None, M, Cmid), lambda g: (g, 0, 0)),
            pl.BlockSpec((None, Cmid, HID), lambda g: (g, 0, 0)),
            pl.BlockSpec((None, 1, HID), lambda g: (g, 0, 0)),
            pl.BlockSpec((HID, PROJ), lambda g: (0, 0)),
            pl.BlockSpec((1, PROJ), lambda g: (0, 0)),
        ],
        out_specs=pl.BlockSpec((M, PROJ), lambda g: (0, 0)),
        out_shape=jax.ShapeDtypeStruct((M, PROJ), jnp.float32),
        compiler_params=pltpu.CompilerParams(dimension_semantics=("arbitrary",)),
    )(pooled, wf, bf, w2, b2)


def head_loss_fused(proj, targets, p):
    """proj/targets: (2N, PROJ).  Returns (1, 1) symmetric BYOL loss."""
    return pl.pallas_call(
        _head_loss_kernel,
        out_shape=jax.ShapeDtypeStruct((1, 1), jnp.float32),
    )(proj, targets.astype(jnp.float32), p["w1"], p["b1"], p["w2"], p["b2"])


# --------------------------------------------------------------------------------------
# Parameter packing (weight-only host prep: layout, bf16 cast, affine folding)
# --------------------------------------------------------------------------------------

def prep_op_params(op_list):
    def stk(k):
        return jnp.stack([op[k] for op in op_list], axis=0)
    w_exp = stk("w_exp")                                              # (G, Cin, Cmid)
    w_dw = stk("w_dw")                                                # (G, 3, 3, Cmid)
    Cmid = w_exp.shape[-1]
    return {
        "wet": jnp.transpose(w_exp, (0, 2, 1)).astype(jnp.bfloat16),  # (G, Cmid, Cin)
        "be": stk("b_exp").astype(jnp.float32)[..., None],            # (G, Cmid, 1)
        "wd": w_dw.reshape(-1, 9, Cmid).astype(jnp.float32)[..., None],  # (G, 9, Cmid, 1)
        "bd": stk("b_dw").astype(jnp.float32)[..., None],             # (G, Cmid, 1)
        "w_proj": stk("w_proj").astype(jnp.float32),                  # (G, Cmid, Cout)
        "b_proj": stk("b_proj").astype(jnp.float32),                  # (G, Cout)
    }


def fold_proj_into_neck(ops, neck):
    """Fold the per-op project 1x1 (affine, no activation, BN=identity) into neck linear-1.

    relu((x @ Wp + bp) @ W1 + b1) == relu(x @ (Wp @ W1) + (bp @ W1 + b1))   (exact).
    Removes the per-image M=1 project matmul flagged by the performance review.
    """
    w1 = neck["w1"].astype(jnp.float32)                               # (Cout, HID)
    b1 = neck["b1"].astype(jnp.float32)                               # (HID,)
    wf = jnp.einsum("gmo,oh->gmh", ops["w_proj"], w1)                 # (G, Cmid, HID)
    bf = ops["b_proj"] @ w1 + b1[None, :]                             # (G, HID)
    return wf.astype(jnp.bfloat16), bf[:, None, :].astype(jnp.float32)


def prep_mlp_params(p):
    return {
        "w1": p["w1"].astype(jnp.bfloat16),
        "b1": p["b1"].reshape(1, -1).astype(jnp.float32),
        "w2": p["w2"].astype(jnp.bfloat16),
        "b2": p["b2"].reshape(1, -1).astype(jnp.float32),
    }


# --------------------------------------------------------------------------------------
# Model glue: siamese forward passes
# --------------------------------------------------------------------------------------

def forward_target(img, target_ops, target_neck, forward_op_target):
    """Averaged, L2-normalized target projections over all candidate ops (no-grad path)."""
    N, V = img.shape[0], img.shape[1]
    v2 = V // 2
    G = len(forward_op_target)
    # TODO(synk): concat_all_gather / batch shuffle are identity at world_size == 1.
    ops = prep_op_params([target_ops[c] for c in forward_op_target])
    pooled = backbone_pool(img, ops, view_index_fn=lambda g, h: g + h * v2)  # (G, 2, N, Cmid)

    neck = prep_mlp_params(target_neck)
    wf, bf = fold_proj_into_neck(ops, target_neck)
    # per-op projections are L2-normalized, then averaged over ops (matches reference order)
    z = neck_apply_avg(pooled.reshape(G, 2 * N, -1), wf, bf, neck["w2"], neck["b2"],
                       normalize=True)                                  # (2N, PROJ)
    z = jax.lax.stop_gradient(z)
    return z[:N], z[N:]


def forward_train(img, online_ops, online_neck, head_params,
                  proj_target_v1, proj_target_v2, forward_singleop_online, idx=0):
    assert img.ndim == 5, "Input must have 5 dims"
    N, V = img.shape[0], img.shape[1]
    v2 = V // 2
    # start_block == 0 -> no best_paths prefix
    ops = prep_op_params([online_ops[forward_singleop_online]])
    pooled = backbone_pool(img, ops, view_index_fn=lambda g, h: idx + h * v2)  # (1, 2, N, Cmid)

    neck = prep_mlp_params(online_neck)
    wf, bf = fold_proj_into_neck(ops, online_neck)
    proj = neck_apply_avg(pooled.reshape(1, 2 * N, -1), wf, bf, neck["w2"], neck["b2"],
                          normalize=False)                              # (2N, PROJ)

    # loss = head(pred(v1), t_v2) + head(pred(v2), t_v1)  (fused into one kernel)
    targets = jnp.concatenate([proj_target_v2, proj_target_v1], axis=0)
    loss = head_loss_fused(proj, targets, prep_mlp_params(head_params))
    return loss[0, 0]


# --------------------------------------------------------------------------------------
# Deterministic parameter init + demo run
# --------------------------------------------------------------------------------------

if __name__ == "__main__":
    key = jax.random.PRNGKey(0)
    keys = jax.random.split(key, 8)

    N = 2                 # batch
    NUM_OPS = 2           # candidate ops in the supernet block
    C_IN, H, W = 4, 16, 16
    C_MID, C_OUT = 8, 16
    HID, PROJ = 32, 32

    # img: (N, 2*num_ops, C, H, W) — two augmented views per candidate op (NCHW per view)
    img = jax.random.normal(keys[0], (N, 2 * NUM_OPS, C_IN, H, W), jnp.float32)

    def init_op(k):
        ks = jax.random.split(k, 3)
        return {
            "w_exp": 0.1 * jax.random.normal(ks[0], (C_IN, C_MID), jnp.float32),
            "b_exp": jnp.zeros((C_MID,), jnp.float32),
            "w_dw": 0.1 * jax.random.normal(ks[1], (3, 3, C_MID), jnp.float32),
            "b_dw": jnp.zeros((C_MID,), jnp.float32),
            "w_proj": 0.1 * jax.random.normal(ks[2], (C_MID, C_OUT), jnp.float32),
            "b_proj": jnp.zeros((C_OUT,), jnp.float32),
        }

    def init_mlp(k, din, dh, dout):
        ks = jax.random.split(k, 2)
        return {
            "w1": 0.1 * jax.random.normal(ks[0], (din, dh), jnp.float32),
            "b1": jnp.zeros((dh,), jnp.float32),
            "w2": 0.1 * jax.random.normal(ks[1], (dh, dout), jnp.float32),
            "b2": jnp.zeros((dout,), jnp.float32),
        }

    online_ops = [init_op(keys[1]), init_op(keys[2])]
    # init_weights copies online -> target
    target_ops = jax.tree_util.tree_map(lambda x: x, online_ops)
    online_neck = init_mlp(keys[3], C_OUT, HID, PROJ)
    target_neck = jax.tree_util.tree_map(lambda x: x, online_neck)
    head_params = init_mlp(keys[4], PROJ, HID, PROJ)

    # one supernet block (num_block=1), each view pair uses one candidate-op choice
    forward_op_online = [0, 1]

    @jax.jit
    def run(img_in):
        # mode='target': build averaged target projections
        proj_t_v1, proj_t_v2 = forward_target(img_in, target_ops, target_neck,
                                              forward_op_online)
        # mode='train': symmetric BYOL-style loss for candidate op 0
        return forward_train(img_in, online_ops, online_neck, head_params,
                             proj_t_v1, proj_t_v2, forward_singleop_online=0, idx=0)

    loss = jax.block_until_ready(run(img))
    assert jnp.isfinite(loss)
    print("KERNEL_OK")
</pallas_src>

<mosaic_0001>
module attributes {stable_mosaic.version = 11 : i64} {
  func.func @_backbone_pool_kernel(%arg0: i32, %arg1: i32, %arg2: i32, %arg3: memref<2x1x4x256xf32, #tpu.memory_space<vmem>>, %arg4: memref<1x8x4xbf16, #tpu.memory_space<vmem>>, %arg5: memref<1x8x1xf32, #tpu.memory_space<vmem>>, %arg6: memref<1x9x8x1xf32, #tpu.memory_space<vmem>>, %arg7: memref<1x8x1xf32, #tpu.memory_space<vmem>>, %arg8: memref<1x1x1x2x8xf32, #tpu.memory_space<vmem>>) attributes {dimension_semantics = [#tpu.dimension_semantics<parallel>, #tpu.dimension_semantics<parallel>, #tpu.dimension_semantics<parallel>], iteration_bounds = array<i64: 2, 2, 1>, scalar_prefetch = 0 : i64, scratch_operands = 0 : i64, tpu.core_type = #tpu.core_type<tc>, window_params = [{transform_indices = @transform_0, window_bounds = array<i64: 2, 1, 4, 256>}, {transform_indices = @transform_1, window_bounds = array<i64: 1, 8, 4>}, {transform_indices = @transform_2, window_bounds = array<i64: 1, 8, 1>}, {transform_indices = @transform_3, window_bounds = array<i64: 1, 9, 8, 1>}, {transform_indices = @transform_4, window_bounds = array<i64: 1, 8, 1>}, {transform_indices = @transform_5, window_bounds = array<i64: 1, 1, 1, 2, 8>}]} {
    %c0 = arith.constant 0 : index
    %c0_0 = arith.constant 0 : index
    %c0_1 = arith.constant 0 : index
    %c0_2 = arith.constant 0 : index
    %0 = vector.load %arg3[%c0, %c0_0, %c0_1, %c0_2] : memref<2x1x4x256xf32, #tpu.memory_space<vmem>>, vector<2x1x4x256xf32>
    %1 = vector.shape_cast %0 : vector<2x1x4x256xf32> to vector<2x4x256xf32>
    %2 = arith.truncf %1 : vector<2x4x256xf32> to vector<2x4x256xbf16>
    %c0_3 = arith.constant 0 : index
    %c0_4 = arith.constant 0 : index
    %c0_5 = arith.constant 0 : index
    %3 = vector.load %arg4[%c0_3, %c0_4, %c0_5] : memref<1x8x4xbf16, #tpu.memory_space<vmem>>, vector<1x8x4xbf16>
    %4 = vector.shape_cast %3 : vector<1x8x4xbf16> to vector<8x4xbf16>
    %5 = vector.extract_strided_slice %2 {offsets = [0, 0, 0], sizes = [1, 4, 256], strides = [1, 1, 1]} : vector<2x4x256xbf16> to vector<1x4x256xbf16>
    %6 = vector.shape_cast %5 : vector<1x4x256xbf16> to vector<4x256xbf16>
    %cst = arith.constant dense<0.000000e+00> : vector<8x256xf32>
    %7 = tpu.matmul %4, %6, %cst {dimension_numbers = #tpu.dot_dimension_numbers<[1], [0], [0], [1], [0, 0, 1, 1], [], []>} : vector<8x4xbf16>, vector<4x256xbf16>, vector<8x256xf32> -> vector<8x256xf32>
    %8 = vector.extract_strided_slice %2 {offsets = [1, 0, 0], sizes = [1, 4, 256], strides = [1, 1, 1]} : vector<2x4x256xbf16> to vector<1x4x256xbf16>
    %9 = vector.shape_cast %8 : vector<1x4x256xbf16> to vector<4x256xbf16>
    %cst_6 = arith.constant dense<0.000000e+00> : vector<8x256xf32>
    %10 = tpu.matmul %4, %9, %cst_6 {dimension_numbers = #tpu.dot_dimension_numbers<[1], [0], [0], [1], [0, 0, 1, 1], [], []>} : vector<8x4xbf16>, vector<4x256xbf16>, vector<8x256xf32> -> vector<8x256xf32>
    %11 = vector.shape_cast %7 : vector<8x256xf32> to vector<1x8x256xf32>
    %12 = vector.shape_cast %10 : vector<8x256xf32> to vector<1x8x256xf32>
    %13 = tpu.concatenate %11, %12 in 0 : vector<1x8x256xf32>, vector<1x8x256xf32> -> vector<2x8x256xf32>
    %c0_7 = arith.constant 0 : index
    %c0_8 = arith.constant 0 : index
    %c0_9 = arith.constant 0 : index
    %14 = vector.load %arg5[%c0_7, %c0_8, %c0_9] : memref<1x8x1xf32, #tpu.memory_space<vmem>>, vector<1x8x1xf32>
    %15 = vector.shape_cast %14 : vector<1x8x1xf32> to vector<8x1xf32>
    %16 = vector.shape_cast %15 : vector<8x1xf32> to vector<1x8x1xf32>
    %17 = vector.broadcast %16 : vector<1x8x1xf32> to vector<2x8x256xf32>
    %18 = arith.addf %13, %17 : vector<2x8x256xf32>
    %cst_10 = arith.constant 0.000000e+00 : f32
    %19 = vector.broadcast %cst_10 : f32 to vector<2x8x256xf32>
    %20 = arith.maximumf %18, %19 : vector<2x8x256xf32>
    %c0_11 = arith.constant 0 : index
    %c0_12 = arith.constant 0 : index
    %c0_13 = arith.constant 0 : index
    %c0_14 = arith.constant 0 : index
    %21 = vector.load %arg6[%c0_11, %c0_12, %c0_13, %c0_14] : memref<1x9x8x1xf32, #tpu.memory_space<vmem>>, vector<1x9x8x1xf32>
    %22 = vector.shape_cast %21 : vector<1x9x8x1xf32> to vector<9x8x1xf32>
    %23 = tpu.iota {dimensions = array<i32: 2>} : vector<1x1x256xi32>
    %c16_i32 = arith.constant 16 : i32
    %c0_i32 = arith.constant 0 : i32
    %24 = arith.cmpi eq, %c16_i32, %c0_i32 : i32
    %c1_i32 = arith.constant 1 : i32
    %25 = arith.select %24, %c1_i32, %c16_i32 : i32
    %26 = vector.broadcast %25 : i32 to vector<1x1x256xi32>
    %27 = arith.remsi %23, %26 : vector<1x1x256xi32>
    %c0_i32_15 = arith.constant 0 : i32
    %28 = vector.broadcast %c0_i32_15 : i32 to vector<1x1x256xi32>
    %29 = arith.cmpi ne, %27, %28 : vector<1x1x256xi32>
    %c0_i32_16 = arith.constant 0 : i32
    %30 = vector.broadcast %c0_i32_16 : i32 to vector<1x1x256xi32>
    %31 = arith.cmpi slt, %27, %30 : vector<1x1x256xi32>
    %c0_i32_17 = arith.constant 0 : i32
    %32 = arith.cmpi slt, %25, %c0_i32_17 : i32
    %33 = vector.broadcast %32 : i1 to vector<1x1x256xi1>
    %34 = vector.broadcast %33 : vector<1x1x256xi1> to vector<1x1x256xi1>
    %35 = arith.xori %31, %34 : vector<1x1x256xi1>
    %36 = arith.andi %35, %29 : vector<1x1x256xi1>
    %37 = vector.broadcast %25 : i32 to vector<1x1x256xi32>
    %38 = arith.addi %27, %37 : vector<1x1x256xi32>
    %39 = arith.select %36, %38, %27 : vector<1x1x256xi1>, vector<1x1x256xi32>
    %cst_18 = arith.constant 0.000000e+00 : f32
    %40 = vector.broadcast %cst_18 : f32 to vector<2x8x256xf32>
    %cst_19 = arith.constant 0.000000e+00 : f32
    %41 = vector.broadcast %cst_19 : f32 to vector<2x8x17xf32>
    %42 = vector.extract_strided_slice %20 {offsets = [0, 0, 0], sizes = [2, 8, 239], strides = [1, 1, 1]} : vector<2x8x256xf32> to vector<2x8x239xf32>
    %43 = tpu.concatenate %41, %42 in 2 : vector<2x8x17xf32>, vector<2x8x239xf32> -> vector<2x8x256xf32>
    %c1_i32_20 = arith.constant 1 : i32
    %44 = vector.broadcast %c1_i32_20 : i32 to vector<1x1x256xi32>
    %45 = arith.cmpi sge, %39, %44 : vector<1x1x256xi32>
    %cst_21 = arith.constant 0.000000e+00 : f32
    %46 = vector.shape_cast %45 : vector<1x1x256xi1> to vector<1x1x256xi1>
    %47 = vector.broadcast %46 : vector<1x1x256xi1> to vector<2x8x256xi1>
    %48 = vector.broadcast %cst_21 : f32 to vector<2x8x256xf32>
    %49 = arith.select %47, %43, %48 : vector<2x8x256xi1>, vector<2x8x256xf32>
    %50 = vector.extract_strided_slice %22 {offsets = [0, 0, 0], sizes = [1, 8, 1], strides = [1, 1, 1]} : vector<9x8x1xf32> to vector<1x8x1xf32>
    %51 = vector.shape_cast %50 : vector<1x8x1xf32> to vector<8x1xf32>
    %52 = vector.shape_cast %51 : vector<8x1xf32> to vector<1x8x1xf32>
    %53 = vector.broadcast %52 : vector<1x8x1xf32> to vector<2x8x256xf32>
    %54 = arith.mulf %49, %53 : vector<2x8x256xf32>
    %55 = arith.addf %40, %54 : vector<2x8x256xf32>
    %cst_22 = arith.constant 0.000000e+00 : f32
    %56 = vector.broadcast %cst_22 : f32 to vector<2x8x16xf32>
    %57 = vector.extract_strided_slice %20 {offsets = [0, 0, 0], sizes = [2, 8, 240], strides = [1, 1, 1]} : vector<2x8x256xf32> to vector<2x8x240xf32>
    %58 = tpu.concatenate %56, %57 in 2 : vector<2x8x16xf32>, vector<2x8x240xf32> -> vector<2x8x256xf32>
    %59 = vector.extract_strided_slice %22 {offsets = [1, 0, 0], sizes = [1, 8, 1], strides = [1, 1, 1]} : vector<9x8x1xf32> to vector<1x8x1xf32>
    %60 = vector.shape_cast %59 : vector<1x8x1xf32> to vector<8x1xf32>
    %61 = vector.shape_cast %60 : vector<8x1xf32> to vector<1x8x1xf32>
    %62 = vector.broadcast %61 : vector<1x8x1xf32> to vector<2x8x256xf32>
    %63 = arith.mulf %58, %62 : vector<2x8x256xf32>
    %64 = arith.addf %55, %63 : vector<2x8x256xf32>
    %cst_23 = arith.constant 0.000000e+00 : f32
    %65 = vector.broadcast %cst_23 : f32 to vector<2x8x15xf32>
    %66 = vector.extract_strided_slice %20 {offsets = [0, 0, 0], sizes = [2, 8, 241], strides = [1, 1, 1]} : vector<2x8x256xf32> to vector<2x8x241xf32>
    %67 = tpu.concatenate %65, %66 in 2 : vector<2x8x15xf32>, vector<2x8x241xf32> -> vector<2x8x256xf32>
    %c15_i32 = arith.constant 15 : i32
    %68 = vector.broadcast %c15_i32 : i32 to vector<1x1x256xi32>
    %69 = arith.cmpi slt, %39, %68 : vector<1x1x256xi32>
    %cst_24 = arith.constant 0.000000e+00 : f32
    %70 = vector.shape_cast %69 : vector<1x1x256xi1> to vector<1x1x256xi1>
    %71 = vector.broadcast %70 : vector<1x1x256xi1> to vector<2x8x256xi1>
    %72 = vector.broadcast %cst_24 : f32 to vector<2x8x256xf32>
    %73 = arith.select %71, %67, %72 : vector<2x8x256xi1>, vector<2x8x256xf32>
    %74 = vector.extract_strided_slice %22 {offsets = [2, 0, 0], sizes = [1, 8, 1], strides = [1, 1, 1]} : vector<9x8x1xf32> to vector<1x8x1xf32>
    %75 = vector.shape_cast %74 : vector<1x8x1xf32> to vector<8x1xf32>
    %76 = vector.shape_cast %75 : vector<8x1xf32> to vector<1x8x1xf32>
    %77 = vector.broadcast %76 : vector<1x8x1xf32> to vector<2x8x256xf32>
    %78 = arith.mulf %73, %77 : vector<2x8x256xf32>
    %79 = arith.addf %64, %78 : vector<2x8x256xf32>
    %cst_25 = arith.constant 0.000000e+00 : f32
    %80 = vector.broadcast %cst_25 : f32 to vector<2x8x1xf32>
    %81 = vector.extract_strided_slice %20 {offsets = [0, 0, 0], sizes = [2, 8, 255], strides = [1, 1, 1]} : vector<2x8x256xf32> to vector<2x8x255xf32>
    %82 = tpu.concatenate %80, %81 in 2 : vector<2x8x1xf32>, vector<2x8x255xf32> -> vector<2x8x256xf32>
    %c1_i32_26 = arith.constant 1 : i32
    %83 = vector.broadcast %c1_i32_26 : i32 to vector<1x1x256xi32>
    %84 = arith.cmpi sge, %39, %83 : vector<1x1x256xi32>
    %cst_27 = arith.constant 0.000000e+00 : f32
    %85 = vector.shape_cast %84 : vector<1x1x256xi1> to vector<1x1x256xi1>
    %86 = vector.broadcast %85 : vector<1x1x256xi1> to vector<2x8x256xi1>
    %87 = vector.broadcast %cst_27 : f32 to vector<2x8x256xf32>
    %88 = arith.select %86, %82, %87 : vector<2x8x256xi1>, vector<2x8x256xf32>
    %89 = vector.extract_strided_slice %22 {offsets = [3, 0, 0], sizes = [1, 8, 1], strides = [1, 1, 1]} : vector<9x8x1xf32> to vector<1x8x1xf32>
    %90 = vector.shape_cast %89 : vector<1x8x1xf32> to vector<8x1xf32>
    %91 = vector.shape_cast %90 : vector<8x1xf32> to vector<1x8x1xf32>
    %92 = vector.broadcast %91 : vector<1x8x1xf32> to vector<2x8x256xf32>
    %93 = arith.mulf %88, %92 : vector<2x8x256xf32>
    %94 = arith.addf %79, %93 : vector<2x8x256xf32>
    %95 = vector.extract_strided_slice %22 {offsets = [4, 0, 0], sizes = [1, 8, 1], strides = [1, 1, 1]} : vector<9x8x1xf32> to vector<1x8x1xf32>
    %96 = vector.shape_cast %95 : vector<1x8x1xf32> to vector<8x1xf32>
    %97 = vector.shape_cast %96 : vector<8x1xf32> to vector<1x8x1xf32>
    %98 = vector.broadcast %97 : vector<1x8x1xf32> to vector<2x8x256xf32>
    %99 = arith.mulf %20, %98 : vector<2x8x256xf32>
    %100 = arith.addf %94, %99 : vector<2x8x256xf32>
    %cst_28 = arith.constant 0.000000e+00 : f32
    %101 = vector.broadcast %cst_28 : f32 to vector<2x8x1xf32>
    %102 = vector.extract_strided_slice %20 {offsets = [0, 0, 1], sizes = [2, 8, 255], strides = [1, 1, 1]} : vector<2x8x256xf32> to vector<2x8x255xf32>
    %103 = tpu.concatenate %102, %101 in 2 : vector<2x8x255xf32>, vector<2x8x1xf32> -> vector<2x8x256xf32>
    %c15_i32_29 = arith.constant 15 : i32
    %104 = vector.broadcast %c15_i32_29 : i32 to vector<1x1x256xi32>
    %105 = arith.cmpi slt, %39, %104 : vector<1x1x256xi32>
    %cst_30 = arith.constant 0.000000e+00 : f32
    %106 = vector.shape_cast %105 : vector<1x1x256xi1> to vector<1x1x256xi1>
    %107 = vector.broadcast %106 : vector<1x1x256xi1> to vector<2x8x256xi1>
    %108 = vector.broadcast %cst_30 : f32 to vector<2x8x256xf32>
    %109 = arith.select %107, %103, %108 : vector<2x8x256xi1>, vector<2x8x256xf32>
    %110 = vector.extract_strided_slice %22 {offsets = [5, 0, 0], sizes = [1, 8, 1], strides = [1, 1, 1]} : vector<9x8x1xf32> to vector<1x8x1xf32>
    %111 = vector.shape_cast %110 : vector<1x8x1xf32> to vector<8x1xf32>
    %112 = vector.shape_cast %111 : vector<8x1xf32> to vector<1x8x1xf32>
    %113 = vector.broadcast %112 : vector<1x8x1xf32> to vector<2x8x256xf32>
    %114 = arith.mulf %109, %113 : vector<2x8x256xf32>
    %115 = arith.addf %100, %114 : vector<2x8x256xf32>
    %cst_31 = arith.constant 0.000000e+00 : f32
    %116 = vector.broadcast %cst_31 : f32 to vector<2x8x15xf32>
    %117 = vector.extract_strided_slice %20 {offsets = [0, 0, 15], sizes = [2, 8, 241], strides = [1, 1, 1]} : vector<2x8x256xf32> to vector<2x8x241xf32>
    %118 = tpu.concatenate %117, %116 in 2 : vector<2x8x241xf32>, vector<2x8x15xf32> -> vector<2x8x256xf32>
    %c1_i32_32 = arith.constant 1 : i32
    %119 = vector.broadcast %c1_i32_32 : i32 to vector<1x1x256xi32>
    %120 = arith.cmpi sge, %39, %119 : vector<1x1x256xi32>
    %cst_33 = arith.constant 0.000000e+00 : f32
    %121 = vector.shape_cast %120 : vector<1x1x256xi1> to vector<1x1x256xi1>
    %122 = vector.broadcast %121 : vector<1x1x256xi1> to vector<2x8x256xi1>
    %123 = vector.broadcast %cst_33 : f32 to vector<2x8x256xf32>
    %124 = arith.select %122, %118, %123 : vector<2x8x256xi1>, vector<2x8x256xf32>
    %125 = vector.extract_strided_slice %22 {offsets = [6, 0, 0], sizes = [1, 8, 1], strides = [1, 1, 1]} : vector<9x8x1xf32> to vector<1x8x1xf32>
    %126 = vector.shape_cast %125 : vector<1x8x1xf32> to vector<8x1xf32>
    %127 = vector.shape_cast %126 : vector<8x1xf32> to vector<1x8x1xf32>
    %128 = vector.broadcast %127 : vector<1x8x1xf32> to vector<2x8x256xf32>
    %129 = arith.mulf %124, %128 : vector<2x8x256xf32>
    %130 = arith.addf %115, %129 : vector<2x8x256xf32>
    %cst_34 = arith.constant 0.000000e+00 : f32
    %131 = vector.broadcast %cst_34 : f32 to vector<2x8x16xf32>
    %132 = vector.extract_strided_slice %20 {offsets = [0, 0, 16], sizes = [2, 8, 240], strides = [1, 1, 1]} : vector<2x8x256xf32> to vector<2x8x240xf32>
    %133 = tpu.concatenate %132, %131 in 2 : vector<2x8x240xf32>, vector<2x8x16xf32> -> vector<2x8x256xf32>
    %134 = vector.extract_strided_slice %22 {offsets = [7, 0, 0], sizes = [1, 8, 1], strides = [1, 1, 1]} : vector<9x8x1xf32> to vector<1x8x1xf32>
    %135 = vector.shape_cast %134 : vector<1x8x1xf32> to vector<8x1xf32>
    %136 = vector.shape_cast %135 : vector<8x1xf32> to vector<1x8x1xf32>
    %137 = vector.broadcast %136 : vector<1x8x1xf32> to vector<2x8x256xf32>
    %138 = arith.mulf %133, %137 : vector<2x8x256xf32>
    %139 = arith.addf %130, %138 : vector<2x8x256xf32>
    %cst_35 = arith.constant 0.000000e+00 : f32
    %140 = vector.broadcast %cst_35 : f32 to vector<2x8x17xf32>
    %141 = vector.extract_strided_slice %20 {offsets = [0, 0, 17], sizes = [2, 8, 239], strides = [1, 1, 1]} : vector<2x8x256xf32> to vector<2x8x239xf32>
    %142 = tpu.concatenate %141, %140 in 2 : vector<2x8x239xf32>, vector<2x8x17xf32> -> vector<2x8x256xf32>
    %c15_i32_36 = arith.constant 15 : i32
    %143 = vector.broadcast %c15_i32_36 : i32 to vector<1x1x256xi32>
    %144 = arith.cmpi slt, %39, %143 : vector<1x1x256xi32>
    %cst_37 = arith.constant 0.000000e+00 : f32
    %145 = vector.shape_cast %144 : vector<1x1x256xi1> to vector<1x1x256xi1>
    %146 = vector.broadcast %145 : vector<1x1x256xi1> to vector<2x8x256xi1>
    %147 = vector.broadcast %cst_37 : f32 to vector<2x8x256xf32>
    %148 = arith.select %146, %142, %147 : vector<2x8x256xi1>, vector<2x8x256xf32>
    %149 = vector.extract_strided_slice %22 {offsets = [8, 0, 0], sizes = [1, 8, 1], strides = [1, 1, 1]} : vector<9x8x1xf32> to vector<1x8x1xf32>
    %150 = vector.shape_cast %149 : vector<1x8x1xf32> to vector<8x1xf32>
    %151 = vector.shape_cast %150 : vector<8x1xf32> to vector<1x8x1xf32>
    %152 = vector.broadcast %151 : vector<1x8x1xf32> to vector<2x8x256xf32>
    %153 = arith.mulf %148, %152 : vector<2x8x256xf32>
    %154 = arith.addf %139, %153 : vector<2x8x256xf32>
    %c0_38 = arith.constant 0 : index
    %c0_39 = arith.constant 0 : index
    %c0_40 = arith.constant 0 : index
    %155 = vector.load %arg7[%c0_38, %c0_39, %c0_40] : memref<1x8x1xf32, #tpu.memory_space<vmem>>, vector<1x8x1xf32>
    %156 = vector.shape_cast %155 : vector<1x8x1xf32> to vector<8x1xf32>
    %157 = vector.shape_cast %156 : vector<8x1xf32> to vector<1x8x1xf32>
    %158 = vector.broadcast %157 : vector<1x8x1xf32> to vector<2x8x256xf32>
    %159 = arith.addf %154, %158 : vector<2x8x256xf32>
    %cst_41 = arith.constant 0.000000e+00 : f32
    %160 = vector.broadcast %cst_41 : f32 to vector<2x8x256xf32>
    %161 = arith.maximumf %159, %160 : vector<2x8x256xf32>
    %cst_42 = arith.constant dense<0.000000e+00> : vector<2x8xf32>
    %162 = vector.multi_reduction <add>, %161, %cst_42 [2] : vector<2x8x256xf32> to vector<2x8xf32>
    %cst_43 = arith.constant 2.560000e+02 : f32
    %163 = vector.broadcast %cst_43 : f32 to vector<2x8xf32>
    %164 = arith.divf %162, %163 : vector<2x8xf32>
    %c0_44 = arith.constant 0 : index
    %c0_45 = arith.constant 0 : index
    %c0_46 = arith.constant 0 : index
    %c0_47 = arith.constant 0 : index
    %c0_48 = arith.constant 0 : index
    %165 = vector.load %arg8[%c0_44, %c0_45, %c0_46, %c0_47, %c0_48] : memref<1x1x1x2x8xf32, #tpu.memory_space<vmem>>, vector<1x1x1x2x8xf32>
    %166 = vector.shape_cast %165 : vector<1x1x1x2x8xf32> to vector<2x8xf32>
    %167 = vector.shape_cast %164 : vector<2x8xf32> to vector<1x1x1x2x8xf32>
    tpu.vector_store %arg8[%c0_44, %c0_45, %c0_46, %c0_47, %c0_48], %167 {strides = array<i32>} : memref<1x1x1x2x8xf32, #tpu.memory_space<vmem>>, vector<1x1x1x2x8xf32>,
    return
  }
  func.func @transform_0(%arg0: i32, %arg1: i32, %arg2: i32) -> (i32, i32, i32, i32) {
    %c2_i32 = arith.constant 2 : i32
    %0 = arith.muli %arg1, %c2_i32 : i32
    %1 = arith.addi %arg0, %0 : i32
    %c0_i32 = arith.constant 0 : i32
    %c0_i32_0 = arith.constant 0 : i32
    %c0_i32_1 = arith.constant 0 : i32
    return %arg2, %1, %c0_i32, %c0_i32_0 : i32, i32, i32, i32
  }
  func.func @transform_1(%arg0: i32, %arg1: i32, %arg2: i32) -> (i32, i32, i32) {
    %c0_i32 = arith.constant 0 : i32
    %c0_i32_0 = arith.constant 0 : i32
    %c0_i32_1 = arith.constant 0 : i32
    return %arg0, %c0_i32, %c0_i32_0 : i32, i32, i32
  }
  func.func @transform_2(%arg0: i32, %arg1: i32, %arg2: i32) -> (i32, i32, i32) {
    %c0_i32 = arith.constant 0 : i32
    %c0_i32_0 = arith.constant 0 : i32
    %c0_i32_1 = arith.constant 0 : i32
    return %arg0, %c0_i32, %c0_i32_0 : i32, i32, i32
  }
  func.func @transform_3(%arg0: i32, %arg1: i32, %arg2: i32) -> (i32, i32, i32, i32) {
    %c0_i32 = arith.constant 0 : i32
    %c0_i32_0 = arith.constant 0 : i32
    %c0_i32_1 = arith.constant 0 : i32
    %c0_i32_2 = arith.constant 0 : i32
    return %arg0, %c0_i32, %c0_i32_0, %c0_i32_1 : i32, i32, i32, i32
  }
  func.func @transform_4(%arg0: i32, %arg1: i32, %arg2: i32) -> (i32, i32, i32) {
    %c0_i32 = arith.constant 0 : i32
    %c0_i32_0 = arith.constant 0 : i32
    %c0_i32_1 = arith.constant 0 : i32
    return %arg0, %c0_i32, %c0_i32_0 : i32, i32, i32
  }
  func.func @transform_5(%arg0: i32, %arg1: i32, %arg2: i32) -> (i32, i32, i32, i32, i32) {
    %c0_i32 = arith.constant 0 : i32
    %c0_i32_0 = arith.constant 0 : i32
    %c0_i32_1 = arith.constant 0 : i32
    return %arg0, %arg1, %arg2, %c0_i32, %c0_i32_0 : i32, i32, i32, i32, i32
  }
}

module attributes {stable_mosaic.version = 11 : i64} {
  func.func @_neck_kernel(%arg0: i32, %arg1: memref<1x4x8xf32, #tpu.memory_space<vmem>>, %arg2: memref<1x8x32xbf16, #tpu.memory_space<vmem>>, %arg3: memref<1x1x32xf32, #tpu.memory_space<vmem>>, %arg4: memref<32x32xbf16, #tpu.memory_space<vmem>>, %arg5: memref<1x32xf32, #tpu.memory_space<vmem>>, %arg6: memref<4x32xf32, #tpu.memory_space<vmem>>) attributes {dimension_semantics = [#tpu.dimension_semantics<arbitrary>], iteration_bounds = array<i64: 2>, scalar_prefetch = 0 : i64, scratch_operands = 0 : i64, tpu.core_type = #tpu.core_type<tc>, window_params = [{transform_indices = @transform_0, window_bounds = array<i64: 1, 4, 8>}, {transform_indices = @transform_1, window_bounds = array<i64: 1, 8, 32>}, {transform_indices = @transform_2, window_bounds = array<i64: 1, 1, 32>}, {pipeline_mode = #tpu.pipeline_mode<synchronous>, transform_indices = @transform_3, window_bounds = array<i64: 32, 32>}, {pipeline_mode = #tpu.pipeline_mode<synchronous>, transform_indices = @transform_4, window_bounds = array<i64: 1, 32>}, {pipeline_mode = #tpu.pipeline_mode<synchronous>, transform_indices = @transform_5, window_bounds = array<i64: 4, 32>}]} {
    %c0 = arith.constant 0 : index
    %c0_0 = arith.constant 0 : index
    %c0_1 = arith.constant 0 : index
    %0 = vector.load %arg1[%c0, %c0_0, %c0_1] : memref<1x4x8xf32, #tpu.memory_space<vmem>>, vector<1x4x8xf32>
    %1 = vector.shape_cast %0 : vector<1x4x8xf32> to vector<4x8xf32>
    %2 = arith.truncf %1 : vector<4x8xf32> to vector<4x8xbf16>
    %c0_2 = arith.constant 0 : index
    %c0_3 = arith.constant 0 : index
    %c0_4 = arith.constant 0 : index
    %3 = vector.load %arg2[%c0_2, %c0_3, %c0_4] : memref<1x8x32xbf16, #tpu.memory_space<vmem>>, vector<1x8x32xbf16>
    %4 = vector.shape_cast %3 : vector<1x8x32xbf16> to vector<8x32xbf16>
    %cst = arith.constant dense<0.000000e+00> : vector<4x32xf32>
    %5 = tpu.matmul %2, %4, %cst {dimension_numbers = #tpu.dot_dimension_numbers<[1], [0], [0], [1], [0, 0, 1, 1], [], []>} : vector<4x8xbf16>, vector<8x32xbf16>, vector<4x32xf32> -> vector<4x32xf32>
    %c0_5 = arith.constant 0 : index
    %c0_6 = arith.constant 0 : index
    %c0_7 = arith.constant 0 : index
    %6 = vector.load %arg3[%c0_5, %c0_6, %c0_7] : memref<1x1x32xf32, #tpu.memory_space<vmem>>, vector<1x1x32xf32>
    %7 = vector.shape_cast %6 : vector<1x1x32xf32> to vector<1x32xf32>
    %8 = vector.broadcast %7 : vector<1x32xf32> to vector<4x32xf32>
    %9 = arith.addf %5, %8 : vector<4x32xf32>
    %cst_8 = arith.constant 0.000000e+00 : f32
    %10 = vector.broadcast %cst_8 : f32 to vector<4x32xf32>
    %11 = arith.maximumf %9, %10 : vector<4x32xf32>
    %12 = arith.truncf %11 : vector<4x32xf32> to vector<4x32xbf16>
    %c0_9 = arith.constant 0 : index
    %c0_10 = arith.constant 0 : index
    %13 = vector.load %arg4[%c0_9, %c0_10] : memref<32x32xbf16, #tpu.memory_space<vmem>>, vector<32x32xbf16>
    %cst_11 = arith.constant dense<0.000000e+00> : vector<4x32xf32>
    %14 = tpu.matmul %12, %13, %cst_11 {dimension_numbers = #tpu.dot_dimension_numbers<[1], [0], [0], [1], [0, 0, 1, 1], [], []>} : vector<4x32xbf16>, vector<32x32xbf16>, vector<4x32xf32> -> vector<4x32xf32>
    %c0_12 = arith.constant 0 : index
    %c0_13 = arith.constant 0 : index
    %15 = vector.load %arg5[%c0_12, %c0_13] : memref<1x32xf32, #tpu.memory_space<vmem>>, vector<1x32xf32>
    %16 = vector.broadcast %15 : vector<1x32xf32> to vector<4x32xf32>
    %17 = arith.addf %14, %16 : vector<4x32xf32>
    %18 = arith.mulf %17, %17 : vector<4x32xf32>
    %cst_14 = arith.constant dense<0.000000e+00> : vector<4xf32>
    %19 = vector.multi_reduction <add>, %18, %cst_14 [1] : vector<4x32xf32> to vector<4xf32>
    %20 = vector.shape_cast %19 : vector<4xf32> to vector<4x1xf32>
    %cst_15 = arith.constant 1.000000e-24 : f32
    %21 = vector.broadcast %cst_15 : f32 to vector<4x1xf32>
    %22 = arith.addf %20, %21 : vector<4x1xf32>
    %23 = math.rsqrt %22 : vector<4x1xf32>
    %24 = vector.broadcast %23 : vector<4x1xf32> to vector<4x32xf32>
    %25 = arith.mulf %17, %24 : vector<4x32xf32>
    %cst_16 = arith.constant 5.000000e-01 : f32
    %26 = vector.broadcast %cst_16 : f32 to vector<4x32xf32>
    %27 = arith.mulf %25, %26 : vector<4x32xf32>
    %c0_i32 = arith.constant 0 : i32
    %28 = arith.cmpi eq, %arg0, %c0_i32 : i32
    %29 = arith.extui %28 : i1 to i32
    %c0_i32_17 = arith.constant 0 : i32
    %30 = arith.cmpi ne, %29, %c0_i32_17 : i32
    scf.if %30 {
      %c0_20 = arith.constant 0 : index
      %c0_21 = arith.constant 0 : index
      %34 = vector.load %arg6[%c0_20, %c0_21] : memref<4x32xf32, #tpu.memory_space<vmem>>, vector<4x32xf32>
      tpu.vector_store %arg6[%c0_20, %c0_21], %27 {strides = array<i32>} : memref<4x32xf32, #tpu.memory_space<vmem>>, vector<4x32xf32>,
    } else {
    }
    %c0_i32_18 = arith.constant 0 : i32
    %31 = arith.cmpi ne, %arg0, %c0_i32_18 : i32
    %32 = arith.extui %31 : i1 to i32
    %c0_i32_19 = arith.constant 0 : i32
    %33 = arith.cmpi ne, %32, %c0_i32_19 : i32
    scf.if %33 {
      %c0_20 = arith.constant 0 : index
      %c0_21 = arith.constant 0 : index
      %34 = vector.load %arg6[%c0_20, %c0_21] : memref<4x32xf32, #tpu.memory_space<vmem>>, vector<4x32xf32>
      %35 = arith.addf %34, %27 : vector<4x32xf32>
      %c0_22 = arith.constant 0 : index
      %c0_23 = arith.constant 0 : index
      %36 = vector.load %arg6[%c0_22, %c0_23] : memref<4x32xf32, #tpu.memory_space<vmem>>, vector<4x32xf32>
      tpu.vector_store %arg6[%c0_22, %c0_23], %35 {strides = array<i32>} : memref<4x32xf32, #tpu.memory_space<vmem>>, vector<4x32xf32>,
    } else {
    }
    return
  }
  func.func @transform_0(%arg0: i32) -> (i32, i32, i32) {
    %c0_i32 = arith.constant 0 : i32
    %c0_i32_0 = arith.constant 0 : i32
    %c0_i32_1 = arith.constant 0 : i32
    return %arg0, %c0_i32, %c0_i32_0 : i32, i32, i32
  }
  func.func @transform_1(%arg0: i32) -> (i32, i32, i32) {
    %c0_i32 = arith.constant 0 : i32
    %c0_i32_0 = arith.constant 0 : i32
    %c0_i32_1 = arith.constant 0 : i32
    return %arg0, %c0_i32, %c0_i32_0 : i32, i32, i32
  }
  func.func @transform_2(%arg0: i32) -> (i32, i32, i32) {
    %c0_i32 = arith.constant 0 : i32
    %c0_i32_0 = arith.constant 0 : i32
    %c0_i32_1 = arith.constant 0 : i32
    return %arg0, %c0_i32, %c0_i32_0 : i32, i32, i32
  }
  func.func @transform_3(%arg0: i32) -> (i32, i32) {
    %c0_i32 = arith.constant 0 : i32
    %c0_i32_0 = arith.constant 0 : i32
    %c0_i32_1 = arith.constant 0 : i32
    return %c0_i32, %c0_i32_0 : i32, i32
  }
  func.func @transform_4(%arg0: i32) -> (i32, i32) {
    %c0_i32 = arith.constant 0 : i32
    %c0_i32_0 = arith.constant 0 : i32
    %c0_i32_1 = arith.constant 0 : i32
    return %c0_i32, %c0_i32_0 : i32, i32
  }
  func.func @transform_5(%arg0: i32) -> (i32, i32) {
    %c0_i32 = arith.constant 0 : i32
    %c0_i32_0 = arith.constant 0 : i32
    %c0_i32_1 = arith.constant 0 : i32
    return %c0_i32, %c0_i32_0 : i32, i32
  }
}

module attributes {stable_mosaic.version = 11 : i64} {
  func.func @_backbone_pool_kernel(%arg0: i32, %arg1: i32, %arg2: i32, %arg3: memref<2x1x4x256xf32, #tpu.memory_space<vmem>>, %arg4: memref<1x8x4xbf16, #tpu.memory_space<vmem>>, %arg5: memref<1x8x1xf32, #tpu.memory_space<vmem>>, %arg6: memref<1x9x8x1xf32, #tpu.memory_space<vmem>>, %arg7: memref<1x8x1xf32, #tpu.memory_space<vmem>>, %arg8: memref<1x1x1x2x8xf32, #tpu.memory_space<vmem>>) attributes {dimension_semantics = [#tpu.dimension_semantics<parallel>, #tpu.dimension_semantics<parallel>, #tpu.dimension_semantics<parallel>], iteration_bounds = array<i64: 1, 2, 1>, scalar_prefetch = 0 : i64, scratch_operands = 0 : i64, tpu.core_type = #tpu.core_type<tc>, window_params = [{transform_indices = @transform_0, window_bounds = array<i64: 2, 1, 4, 256>}, {transform_indices = @transform_1, window_bounds = array<i64: 1, 8, 4>}, {transform_indices = @transform_2, window_bounds = array<i64: 1, 8, 1>}, {transform_indices = @transform_3, window_bounds = array<i64: 1, 9, 8, 1>}, {transform_indices = @transform_4, window_bounds = array<i64: 1, 8, 1>}, {transform_indices = @transform_5, window_bounds = array<i64: 1, 1, 1, 2, 8>}]} {
    %c0 = arith.constant 0 : index
    %c0_0 = arith.constant 0 : index
    %c0_1 = arith.constant 0 : index
    %c0_2 = arith.constant 0 : index
    %0 = vector.load %arg3[%c0, %c0_0, %c0_1, %c0_2] : memref<2x1x4x256xf32, #tpu.memory_space<vmem>>, vector<2x1x4x256xf32>
    %1 = vector.shape_cast %0 : vector<2x1x4x256xf32> to vector<2x4x256xf32>
    %2 = arith.truncf %1 : vector<2x4x256xf32> to vector<2x4x256xbf16>
    %c0_3 = arith.constant 0 : index
    %c0_4 = arith.constant 0 : index
    %c0_5 = arith.constant 0 : index
    %3 = vector.load %arg4[%c0_3, %c0_4, %c0_5] : memref<1x8x4xbf16, #tpu.memory_space<vmem>>, vector<1x8x4xbf16>
    %4 = vector.shape_cast %3 : vector<1x8x4xbf16> to vector<8x4xbf16>
    %5 = vector.extract_strided_slice %2 {offsets = [0, 0, 0], sizes = [1, 4, 256], strides = [1, 1, 1]} : vector<2x4x256xbf16> to vector<1x4x256xbf16>
    %6 = vector.shape_cast %5 : vector<1x4x256xbf16> to vector<4x256xbf16>
    %cst = arith.constant dense<0.000000e+00> : vector<8x256xf32>
    %7 = tpu.matmul %4, %6, %cst {dimension_numbers = #tpu.dot_dimension_numbers<[1], [0], [0], [1], [0, 0, 1, 1], [], []>} : vector<8x4xbf16>, vector<4x256xbf16>, vector<8x256xf32> -> vector<8x256xf32>
    %8 = vector.extract_strided_slice %2 {offsets = [1, 0, 0], sizes = [1, 4, 256], strides = [1, 1, 1]} : vector<2x4x256xbf16> to vector<1x4x256xbf16>
    %9 = vector.shape_cast %8 : vector<1x4x256xbf16> to vector<4x256xbf16>
    %cst_6 = arith.constant dense<0.000000e+00> : vector<8x256xf32>
    %10 = tpu.matmul %4, %9, %cst_6 {dimension_numbers = #tpu.dot_dimension_numbers<[1], [0], [0], [1], [0, 0, 1, 1], [], []>} : vector<8x4xbf16>, vector<4x256xbf16>, vector<8x256xf32> -> vector<8x256xf32>
    %11 = vector.shape_cast %7 : vector<8x256xf32> to vector<1x8x256xf32>
    %12 = vector.shape_cast %10 : vector<8x256xf32> to vector<1x8x256xf32>
    %13 = tpu.concatenate %11, %12 in 0 : vector<1x8x256xf32>, vector<1x8x256xf32> -> vector<2x8x256xf32>
    %c0_7 = arith.constant 0 : index
    %c0_8 = arith.constant 0 : index
    %c0_9 = arith.constant 0 : index
    %14 = vector.load %arg5[%c0_7, %c0_8, %c0_9] : memref<1x8x1xf32, #tpu.memory_space<vmem>>, vector<1x8x1xf32>
    %15 = vector.shape_cast %14 : vector<1x8x1xf32> to vector<8x1xf32>
    %16 = vector.shape_cast %15 : vector<8x1xf32> to vector<1x8x1xf32>
    %17 = vector.broadcast %16 : vector<1x8x1xf32> to vector<2x8x256xf32>
    %18 = arith.addf %13, %17 : vector<2x8x256xf32>
    %cst_10 = arith.constant 0.000000e+00 : f32
    %19 = vector.broadcast %cst_10 : f32 to vector<2x8x256xf32>
    %20 = arith.maximumf %18, %19 : vector<2x8x256xf32>
    %c0_11 = arith.constant 0 : index
    %c0_12 = arith.constant 0 : index
    %c0_13 = arith.constant 0 : index
    %c0_14 = arith.constant 0 : index
    %21 = vector.load %arg6[%c0_11, %c0_12, %c0_13, %c0_14] : memref<1x9x8x1xf32, #tpu.memory_space<vmem>>, vector<1x9x8x1xf32>
    %22 = vector.shape_cast %21 : vector<1x9x8x1xf32> to vector<9x8x1xf32>
    %23 = tpu.iota {dimensions = array<i32: 2>} : vector<1x1x256xi32>
    %c16_i32 = arith.constant 16 : i32
    %c0_i32 = arith.constant 0 : i32
    %24 = arith.cmpi eq, %c16_i32, %c0_i32 : i32
    %c1_i32 = arith.constant 1 : i32
    %25 = arith.select %24, %c1_i32, %c16_i32 : i32
    %26 = vector.broadcast %25 : i32 to vector<1x1x256xi32>
    %27 = arith.remsi %23, %26 : vector<1x1x256xi32>
    %c0_i32_15 = arith.constant 0 : i32
    %28 = vector.broadcast %c0_i32_15 : i32 to vector<1x1x256xi32>
    %29 = arith.cmpi ne, %27, %28 : vector<1x1x256xi32>
    %c0_i32_16 = arith.constant 0 : i32
    %30 = vector.broadcast %c0_i32_16 : i32 to vector<1x1x256xi32>
    %31 = arith.cmpi slt, %27, %30 : vector<1x1x256xi32>
    %c0_i32_17 = arith.constant 0 : i32
    %32 = arith.cmpi slt, %25, %c0_i32_17 : i32
    %33 = vector.broadcast %32 : i1 to vector<1x1x256xi1>
    %34 = vector.broadcast %33 : vector<1x1x256xi1> to vector<1x1x256xi1>
    %35 = arith.xori %31, %34 : vector<1x1x256xi1>
    %36 = arith.andi %35, %29 : vector<1x1x256xi1>
    %37 = vector.broadcast %25 : i32 to vector<1x1x256xi32>
    %38 = arith.addi %27, %37 : vector<1x1x256xi32>
    %39 = arith.select %36, %38, %27 : vector<1x1x256xi1>, vector<1x1x256xi32>
    %cst_18 = arith.constant 0.000000e+00 : f32
    %40 = vector.broadcast %cst_18 : f32 to vector<2x8x256xf32>
    %cst_19 = arith.constant 0.000000e+00 : f32
    %41 = vector.broadcast %cst_19 : f32 to vector<2x8x17xf32>
    %42 = vector.extract_strided_slice %20 {offsets = [0, 0, 0], sizes = [2, 8, 239], strides = [1, 1, 1]} : vector<2x8x256xf32> to vector<2x8x239xf32>
    %43 = tpu.concatenate %41, %42 in 2 : vector<2x8x17xf32>, vector<2x8x239xf32> -> vector<2x8x256xf32>
    %c1_i32_20 = arith.constant 1 : i32
    %44 = vector.broadcast %c1_i32_20 : i32 to vector<1x1x256xi32>
    %45 = arith.cmpi sge, %39, %44 : vector<1x1x256xi32>
    %cst_21 = arith.constant 0.000000e+00 : f32
    %46 = vector.shape_cast %45 : vector<1x1x256xi1> to vector<1x1x256xi1>
    %47 = vector.broadcast %46 : vector<1x1x256xi1> to vector<2x8x256xi1>
    %48 = vector.broadcast %cst_21 : f32 to vector<2x8x256xf32>
    %49 = arith.select %47, %43, %48 : vector<2x8x256xi1>, vector<2x8x256xf32>
    %50 = vector.extract_strided_slice %22 {offsets = [0, 0, 0], sizes = [1, 8, 1], strides = [1, 1, 1]} : vector<9x8x1xf32> to vector<1x8x1xf32>
    %51 = vector.shape_cast %50 : vector<1x8x1xf32> to vector<8x1xf32>
    %52 = vector.shape_cast %51 : vector<8x1xf32> to vector<1x8x1xf32>
    %53 = vector.broadcast %52 : vector<1x8x1xf32> to vector<2x8x256xf32>
    %54 = arith.mulf %49, %53 : vector<2x8x256xf32>
    %55 = arith.addf %40, %54 : vector<2x8x256xf32>
    %cst_22 = arith.constant 0.000000e+00 : f32
    %56 = vector.broadcast %cst_22 : f32 to vector<2x8x16xf32>
    %57 = vector.extract_strided_slice %20 {offsets = [0, 0, 0], sizes = [2, 8, 240], strides = [1, 1, 1]} : vector<2x8x256xf32> to vector<2x8x240xf32>
    %58 = tpu.concatenate %56, %57 in 2 : vector<2x8x16xf32>, vector<2x8x240xf32> -> vector<2x8x256xf32>
    %59 = vector.extract_strided_slice %22 {offsets = [1, 0, 0], sizes = [1, 8, 1], strides = [1, 1, 1]} : vector<9x8x1xf32> to vector<1x8x1xf32>
    %60 = vector.shape_cast %59 : vector<1x8x1xf32> to vector<8x1xf32>
    %61 = vector.shape_cast %60 : vector<8x1xf32> to vector<1x8x1xf32>
    %62 = vector.broadcast %61 : vector<1x8x1xf32> to vector<2x8x256xf32>
    %63 = arith.mulf %58, %62 : vector<2x8x256xf32>
    %64 = arith.addf %55, %63 : vector<2x8x256xf32>
    %cst_23 = arith.constant 0.000000e+00 : f32
    %65 = vector.broadcast %cst_23 : f32 to vector<2x8x15xf32>
    %66 = vector.extract_strided_slice %20 {offsets = [0, 0, 0], sizes = [2, 8, 241], strides = [1, 1, 1]} : vector<2x8x256xf32> to vector<2x8x241xf32>
    %67 = tpu.concatenate %65, %66 in 2 : vector<2x8x15xf32>, vector<2x8x241xf32> -> vector<2x8x256xf32>
    %c15_i32 = arith.constant 15 : i32
    %68 = vector.broadcast %c15_i32 : i32 to vector<1x1x256xi32>
    %69 = arith.cmpi slt, %39, %68 : vector<1x1x256xi32>
    %cst_24 = arith.constant 0.000000e+00 : f32
    %70 = vector.shape_cast %69 : vector<1x1x256xi1> to vector<1x1x256xi1>
    %71 = vector.broadcast %70 : vector<1x1x256xi1> to vector<2x8x256xi1>
    %72 = vector.broadcast %cst_24 : f32 to vector<2x8x256xf32>
    %73 = arith.select %71, %67, %72 : vector<2x8x256xi1>, vector<2x8x256xf32>
    %74 = vector.extract_strided_slice %22 {offsets = [2, 0, 0], sizes = [1, 8, 1], strides = [1, 1, 1]} : vector<9x8x1xf32> to vector<1x8x1xf32>
    %75 = vector.shape_cast %74 : vector<1x8x1xf32> to vector<8x1xf32>
    %76 = vector.shape_cast %75 : vector<8x1xf32> to vector<1x8x1xf32>
    %77 = vector.broadcast %76 : vector<1x8x1xf32> to vector<2x8x256xf32>
    %78 = arith.mulf %73, %77 : vector<2x8x256xf32>
    %79 = arith.addf %64, %78 : vector<2x8x256xf32>
    %cst_25 = arith.constant 0.000000e+00 : f32
    %80 = vector.broadcast %cst_25 : f32 to vector<2x8x1xf32>
    %81 = vector.extract_strided_slice %20 {offsets = [0, 0, 0], sizes = [2, 8, 255], strides = [1, 1, 1]} : vector<2x8x256xf32> to vector<2x8x255xf32>
    %82 = tpu.concatenate %80, %81 in 2 : vector<2x8x1xf32>, vector<2x8x255xf32> -> vector<2x8x256xf32>
    %c1_i32_26 = arith.constant 1 : i32
    %83 = vector.broadcast %c1_i32_26 : i32 to vector<1x1x256xi32>
    %84 = arith.cmpi sge, %39, %83 : vector<1x1x256xi32>
    %cst_27 = arith.constant 0.000000e+00 : f32
    %85 = vector.shape_cast %84 : vector<1x1x256xi1> to vector<1x1x256xi1>
    %86 = vector.broadcast %85 : vector<1x1x256xi1> to vector<2x8x256xi1>
    %87 = vector.broadcast %cst_27 : f32 to vector<2x8x256xf32>
    %88 = arith.select %86, %82, %87 : vector<2x8x256xi1>, vector<2x8x256xf32>
    %89 = vector.extract_strided_slice %22 {offsets = [3, 0, 0], sizes = [1, 8, 1], strides = [1, 1, 1]} : vector<9x8x1xf32> to vector<1x8x1xf32>
    %90 = vector.shape_cast %89 : vector<1x8x1xf32> to vector<8x1xf32>
    %91 = vector.shape_cast %90 : vector<8x1xf32> to vector<1x8x1xf32>
    %92 = vector.broadcast %91 : vector<1x8x1xf32> to vector<2x8x256xf32>
    %93 = arith.mulf %88, %92 : vector<2x8x256xf32>
    %94 = arith.addf %79, %93 : vector<2x8x256xf32>
    %95 = vector.extract_strided_slice %22 {offsets = [4, 0, 0], sizes = [1, 8, 1], strides = [1, 1, 1]} : vector<9x8x1xf32> to vector<1x8x1xf32>
    %96 = vector.shape_cast %95 : vector<1x8x1xf32> to vector<8x1xf32>
    %97 = vector.shape_cast %96 : vector<8x1xf32> to vector<1x8x1xf32>
    %98 = vector.broadcast %97 : vector<1x8x1xf32> to vector<2x8x256xf32>
    %99 = arith.mulf %20, %98 : vector<2x8x256xf32>
    %100 = arith.addf %94, %99 : vector<2x8x256xf32>
    %cst_28 = arith.constant 0.000000e+00 : f32
    %101 = vector.broadcast %cst_28 : f32 to vector<2x8x1xf32>
    %102 = vector.extract_strided_slice %20 {offsets = [0, 0, 1], sizes = [2, 8, 255], strides = [1, 1, 1]} : vector<2x8x256xf32> to vector<2x8x255xf32>
    %103 = tpu.concatenate %102, %101 in 2 : vector<2x8x255xf32>, vector<2x8x1xf32> -> vector<2x8x256xf32>
    %c15_i32_29 = arith.constant 15 : i32
    %104 = vector.broadcast %c15_i32_29 : i32 to vector<1x1x256xi32>
    %105 = arith.cmpi slt, %39, %104 : vector<1x1x256xi32>
    %cst_30 = arith.constant 0.000000e+00 : f32
    %106 = vector.shape_cast %105 : vector<1x1x256xi1> to vector<1x1x256xi1>
    %107 = vector.broadcast %106 : vector<1x1x256xi1> to vector<2x8x256xi1>
    %108 = vector.broadcast %cst_30 : f32 to vector<2x8x256xf32>
    %109 = arith.select %107, %103, %108 : vector<2x8x256xi1>, vector<2x8x256xf32>
    %110 = vector.extract_strided_slice %22 {offsets = [5, 0, 0], sizes = [1, 8, 1], strides = [1, 1, 1]} : vector<9x8x1xf32> to vector<1x8x1xf32>
    %111 = vector.shape_cast %110 : vector<1x8x1xf32> to vector<8x1xf32>
    %112 = vector.shape_cast %111 : vector<8x1xf32> to vector<1x8x1xf32>
    %113 = vector.broadcast %112 : vector<1x8x1xf32> to vector<2x8x256xf32>
    %114 = arith.mulf %109, %113 : vector<2x8x256xf32>
    %115 = arith.addf %100, %114 : vector<2x8x256xf32>
    %cst_31 = arith.constant 0.000000e+00 : f32
    %116 = vector.broadcast %cst_31 : f32 to vector<2x8x15xf32>
    %117 = vector.extract_strided_slice %20 {offsets = [0, 0, 15], sizes = [2, 8, 241], strides = [1, 1, 1]} : vector<2x8x256xf32> to vector<2x8x241xf32>
    %118 = tpu.concatenate %117, %116 in 2 : vector<2x8x241xf32>, vector<2x8x15xf32> -> vector<2x8x256xf32>
    %c1_i32_32 = arith.constant 1 : i32
    %119 = vector.broadcast %c1_i32_32 : i32 to vector<1x1x256xi32>
    %120 = arith.cmpi sge, %39, %119 : vector<1x1x256xi32>
    %cst_33 = arith.constant 0.000000e+00 : f32
    %121 = vector.shape_cast %120 : vector<1x1x256xi1> to vector<1x1x256xi1>
    %122 = vector.broadcast %121 : vector<1x1x256xi1> to vector<2x8x256xi1>
    %123 = vector.broadcast %cst_33 : f32 to vector<2x8x256xf32>
    %124 = arith.select %122, %118, %123 : vector<2x8x256xi1>, vector<2x8x256xf32>
    %125 = vector.extract_strided_slice %22 {offsets = [6, 0, 0], sizes = [1, 8, 1], strides = [1, 1, 1]} : vector<9x8x1xf32> to vector<1x8x1xf32>
    %126 = vector.shape_cast %125 : vector<1x8x1xf32> to vector<8x1xf32>
    %127 = vector.shape_cast %126 : vector<8x1xf32> to vector<1x8x1xf32>
    %128 = vector.broadcast %127 : vector<1x8x1xf32> to vector<2x8x256xf32>
    %129 = arith.mulf %124, %128 : vector<2x8x256xf32>
    %130 = arith.addf %115, %129 : vector<2x8x256xf32>
    %cst_34 = arith.constant 0.000000e+00 : f32
    %131 = vector.broadcast %cst_34 : f32 to vector<2x8x16xf32>
    %132 = vector.extract_strided_slice %20 {offsets = [0, 0, 16], sizes = [2, 8, 240], strides = [1, 1, 1]} : vector<2x8x256xf32> to vector<2x8x240xf32>
    %133 = tpu.concatenate %132, %131 in 2 : vector<2x8x240xf32>, vector<2x8x16xf32> -> vector<2x8x256xf32>
    %134 = vector.extract_strided_slice %22 {offsets = [7, 0, 0], sizes = [1, 8, 1], strides = [1, 1, 1]} : vector<9x8x1xf32> to vector<1x8x1xf32>
    %135 = vector.shape_cast %134 : vector<1x8x1xf32> to vector<8x1xf32>
    %136 = vector.shape_cast %135 : vector<8x1xf32> to vector<1x8x1xf32>
    %137 = vector.broadcast %136 : vector<1x8x1xf32> to vector<2x8x256xf32>
    %138 = arith.mulf %133, %137 : vector<2x8x256xf32>
    %139 = arith.addf %130, %138 : vector<2x8x256xf32>
    %cst_35 = arith.constant 0.000000e+00 : f32
    %140 = vector.broadcast %cst_35 : f32 to vector<2x8x17xf32>
    %141 = vector.extract_strided_slice %20 {offsets = [0, 0, 17], sizes = [2, 8, 239], strides = [1, 1, 1]} : vector<2x8x256xf32> to vector<2x8x239xf32>
    %142 = tpu.concatenate %141, %140 in 2 : vector<2x8x239xf32>, vector<2x8x17xf32> -> vector<2x8x256xf32>
    %c15_i32_36 = arith.constant 15 : i32
    %143 = vector.broadcast %c15_i32_36 : i32 to vector<1x1x256xi32>
    %144 = arith.cmpi slt, %39, %143 : vector<1x1x256xi32>
    %cst_37 = arith.constant 0.000000e+00 : f32
    %145 = vector.shape_cast %144 : vector<1x1x256xi1> to vector<1x1x256xi1>
    %146 = vector.broadcast %145 : vector<1x1x256xi1> to vector<2x8x256xi1>
    %147 = vector.broadcast %cst_37 : f32 to vector<2x8x256xf32>
    %148 = arith.select %146, %142, %147 : vector<2x8x256xi1>, vector<2x8x256xf32>
    %149 = vector.extract_strided_slice %22 {offsets = [8, 0, 0], sizes = [1, 8, 1], strides = [1, 1, 1]} : vector<9x8x1xf32> to vector<1x8x1xf32>
    %150 = vector.shape_cast %149 : vector<1x8x1xf32> to vector<8x1xf32>
    %151 = vector.shape_cast %150 : vector<8x1xf32> to vector<1x8x1xf32>
    %152 = vector.broadcast %151 : vector<1x8x1xf32> to vector<2x8x256xf32>
    %153 = arith.mulf %148, %152 : vector<2x8x256xf32>
    %154 = arith.addf %139, %153 : vector<2x8x256xf32>
    %c0_38 = arith.constant 0 : index
    %c0_39 = arith.constant 0 : index
    %c0_40 = arith.constant 0 : index
    %155 = vector.load %arg7[%c0_38, %c0_39, %c0_40] : memref<1x8x1xf32, #tpu.memory_space<vmem>>, vector<1x8x1xf32>
    %156 = vector.shape_cast %155 : vector<1x8x1xf32> to vector<8x1xf32>
    %157 = vector.shape_cast %156 : vector<8x1xf32> to vector<1x8x1xf32>
    %158 = vector.broadcast %157 : vector<1x8x1xf32> to vector<2x8x256xf32>
    %159 = arith.addf %154, %158 : vector<2x8x256xf32>
    %cst_41 = arith.constant 0.000000e+00 : f32
    %160 = vector.broadcast %cst_41 : f32 to vector<2x8x256xf32>
    %161 = arith.maximumf %159, %160 : vector<2x8x256xf32>
    %cst_42 = arith.constant dense<0.000000e+00> : vector<2x8xf32>
    %162 = vector.multi_reduction <add>, %161, %cst_42 [2] : vector<2x8x256xf32> to vector<2x8xf32>
    %cst_43 = arith.constant 2.560000e+02 : f32
    %163 = vector.broadcast %cst_43 : f32 to vector<2x8xf32>
    %164 = arith.divf %162, %163 : vector<2x8xf32>
    %c0_44 = arith.constant 0 : index
    %c0_45 = arith.constant 0 : index
    %c0_46 = arith.constant 0 : index
    %c0_47 = arith.constant 0 : index
    %c0_48 = arith.constant 0 : index
    %165 = vector.load %arg8[%c0_44, %c0_45, %c0_46, %c0_47, %c0_48] : memref<1x1x1x2x8xf32, #tpu.memory_space<vmem>>, vector<1x1x1x2x8xf32>
    %166 = vector.shape_cast %165 : vector<1x1x1x2x8xf32> to vector<2x8xf32>
    %167 = vector.shape_cast %164 : vector<2x8xf32> to vector<1x1x1x2x8xf32>
    tpu.vector_store %arg8[%c0_44, %c0_45, %c0_46, %c0_47, %c0_48], %167 {strides = array<i32>} : memref<1x1x1x2x8xf32, #tpu.memory_space<vmem>>, vector<1x1x1x2x8xf32>,
    return
  }
  func.func @transform_0(%arg0: i32, %arg1: i32, %arg2: i32) -> (i32, i32, i32, i32) {
    %c2_i32 = arith.constant 2 : i32
    %0 = arith.muli %arg1, %c2_i32 : i32
    %c0_i32 = arith.constant 0 : i32
    %1 = arith.addi %c0_i32, %0 : i32
    %c0_i32_0 = arith.constant 0 : i32
    %c0_i32_1 = arith.constant 0 : i32
    %c0_i32_2 = arith.constant 0 : i32
    return %arg2, %1, %c0_i32_0, %c0_i32_1 : i32, i32, i32, i32
  }
  func.func @transform_1(%arg0: i32, %arg1: i32, %arg2: i32) -> (i32, i32, i32) {
    %c0_i32 = arith.constant 0 : i32
    %c0_i32_0 = arith.constant 0 : i32
    %c0_i32_1 = arith.constant 0 : i32
    return %arg0, %c0_i32, %c0_i32_0 : i32, i32, i32
  }
  func.func @transform_2(%arg0: i32, %arg1: i32, %arg2: i32) -> (i32, i32, i32) {
    %c0_i32 = arith.constant 0 : i32
    %c0_i32_0 = arith.constant 0 : i32
    %c0_i32_1 = arith.constant 0 : i32
    return %arg0, %c0_i32, %c0_i32_0 : i32, i32, i32
  }
  func.func @transform_3(%arg0: i32, %arg1: i32, %arg2: i32) -> (i32, i32, i32, i32) {
    %c0_i32 = arith.constant 0 : i32
    %c0_i32_0 = arith.constant 0 : i32
    %c0_i32_1 = arith.constant 0 : i32
    %c0_i32_2 = arith.constant 0 : i32
    return %arg0, %c0_i32, %c0_i32_0, %c0_i32_1 : i32, i32, i32, i32
  }
  func.func @transform_4(%arg0: i32, %arg1: i32, %arg2: i32) -> (i32, i32, i32) {
    %c0_i32 = arith.constant 0 : i32
    %c0_i32_0 = arith.constant 0 : i32
    %c0_i32_1 = arith.constant 0 : i32
    return %arg0, %c0_i32, %c0_i32_0 : i32, i32, i32
  }
  func.func @transform_5(%arg0: i32, %arg1: i32, %arg2: i32) -> (i32, i32, i32, i32, i32) {
    %c0_i32 = arith.constant 0 : i32
    %c0_i32_0 = arith.constant 0 : i32
    %c0_i32_1 = arith.constant 0 : i32
    return %arg0, %arg1, %arg2, %c0_i32, %c0_i32_0 : i32, i32, i32, i32, i32
  }
}

module attributes {stable_mosaic.version = 11 : i64} {
  func.func @_neck_kernel(%arg0: i32, %arg1: memref<1x4x8xf32, #tpu.memory_space<vmem>>, %arg2: memref<1x8x32xbf16, #tpu.memory_space<vmem>>, %arg3: memref<1x1x32xf32, #tpu.memory_space<vmem>>, %arg4: memref<32x32xbf16, #tpu.memory_space<vmem>>, %arg5: memref<1x32xf32, #tpu.memory_space<vmem>>, %arg6: memref<4x32xf32, #tpu.memory_space<vmem>>) attributes {dimension_semantics = [#tpu.dimension_semantics<arbitrary>], iteration_bounds = array<i64: 1>, scalar_prefetch = 0 : i64, scratch_operands = 0 : i64, tpu.core_type = #tpu.core_type<tc>, window_params = [{transform_indices = @transform_0, window_bounds = array<i64: 1, 4, 8>}, {transform_indices = @transform_1, window_bounds = array<i64: 1, 8, 32>}, {transform_indices = @transform_2, window_bounds = array<i64: 1, 1, 32>}, {pipeline_mode = #tpu.pipeline_mode<synchronous>, transform_indices = @transform_3, window_bounds = array<i64: 32, 32>}, {pipeline_mode = #tpu.pipeline_mode<synchronous>, transform_indices = @transform_4, window_bounds = array<i64: 1, 32>}, {pipeline_mode = #tpu.pipeline_mode<synchronous>, transform_indices = @transform_5, window_bounds = array<i64: 4, 32>}]} {
    %c0 = arith.constant 0 : index
    %c0_0 = arith.constant 0 : index
    %c0_1 = arith.constant 0 : index
    %0 = vector.load %arg1[%c0, %c0_0, %c0_1] : memref<1x4x8xf32, #tpu.memory_space<vmem>>, vector<1x4x8xf32>
    %1 = vector.shape_cast %0 : vector<1x4x8xf32> to vector<4x8xf32>
    %2 = arith.truncf %1 : vector<4x8xf32> to vector<4x8xbf16>
    %c0_2 = arith.constant 0 : index
    %c0_3 = arith.constant 0 : index
    %c0_4 = arith.constant 0 : index
    %3 = vector.load %arg2[%c0_2, %c0_3, %c0_4] : memref<1x8x32xbf16, #tpu.memory_space<vmem>>, vector<1x8x32xbf16>
    %4 = vector.shape_cast %3 : vector<1x8x32xbf16> to vector<8x32xbf16>
    %cst = arith.constant dense<0.000000e+00> : vector<4x32xf32>
    %5 = tpu.matmul %2, %4, %cst {dimension_numbers = #tpu.dot_dimension_numbers<[1], [0], [0], [1], [0, 0, 1, 1], [], []>} : vector<4x8xbf16>, vector<8x32xbf16>, vector<4x32xf32> -> vector<4x32xf32>
    %c0_5 = arith.constant 0 : index
    %c0_6 = arith.constant 0 : index
    %c0_7 = arith.constant 0 : index
    %6 = vector.load %arg3[%c0_5, %c0_6, %c0_7] : memref<1x1x32xf32, #tpu.memory_space<vmem>>, vector<1x1x32xf32>
    %7 = vector.shape_cast %6 : vector<1x1x32xf32> to vector<1x32xf32>
    %8 = vector.broadcast %7 : vector<1x32xf32> to vector<4x32xf32>
    %9 = arith.addf %5, %8 : vector<4x32xf32>
    %cst_8 = arith.constant 0.000000e+00 : f32
    %10 = vector.broadcast %cst_8 : f32 to vector<4x32xf32>
    %11 = arith.maximumf %9, %10 : vector<4x32xf32>
    %12 = arith.truncf %11 : vector<4x32xf32> to vector<4x32xbf16>
    %c0_9 = arith.constant 0 : index
    %c0_10 = arith.constant 0 : index
    %13 = vector.load %arg4[%c0_9, %c0_10] : memref<32x32xbf16, #tpu.memory_space<vmem>>, vector<32x32xbf16>
    %cst_11 = arith.constant dense<0.000000e+00> : vector<4x32xf32>
    %14 = tpu.matmul %12, %13, %cst_11 {dimension_numbers = #tpu.dot_dimension_numbers<[1], [0], [0], [1], [0, 0, 1, 1], [], []>} : vector<4x32xbf16>, vector<32x32xbf16>, vector<4x32xf32> -> vector<4x32xf32>
    %c0_12 = arith.constant 0 : index
    %c0_13 = arith.constant 0 : index
    %15 = vector.load %arg5[%c0_12, %c0_13] : memref<1x32xf32, #tpu.memory_space<vmem>>, vector<1x32xf32>
    %16 = vector.broadcast %15 : vector<1x32xf32> to vector<4x32xf32>
    %17 = arith.addf %14, %16 : vector<4x32xf32>
    %cst_14 = arith.constant 1.000000e+00 : f32
    %18 = vector.broadcast %cst_14 : f32 to vector<4x32xf32>
    %19 = arith.mulf %17, %18 : vector<4x32xf32>
    %c0_i32 = arith.constant 0 : i32
    %20 = arith.cmpi eq, %arg0, %c0_i32 : i32
    %21 = arith.extui %20 : i1 to i32
    %c0_i32_15 = arith.constant 0 : i32
    %22 = arith.cmpi ne, %21, %c0_i32_15 : i32
    scf.if %22 {
      %c0_18 = arith.constant 0 : index
      %c0_19 = arith.constant 0 : index
      %26 = vector.load %arg6[%c0_18, %c0_19] : memref<4x32xf32, #tpu.memory_space<vmem>>, vector<4x32xf32>
      tpu.vector_store %arg6[%c0_18, %c0_19], %19 {strides = array<i32>} : memref<4x32xf32, #tpu.memory_space<vmem>>, vector<4x32xf32>,
    } else {
    }
    %c0_i32_16 = arith.constant 0 : i32
    %23 = arith.cmpi ne, %arg0, %c0_i32_16 : i32
    %24 = arith.extui %23 : i1 to i32
    %c0_i32_17 = arith.constant 0 : i32
    %25 = arith.cmpi ne, %24, %c0_i32_17 : i32
    scf.if %25 {
      %c0_18 = arith.constant 0 : index
      %c0_19 = arith.constant 0 : index
      %26 = vector.load %arg6[%c0_18, %c0_19] : memref<4x32xf32, #tpu.memory_space<vmem>>, vector<4x32xf32>
      %27 = arith.addf %26, %19 : vector<4x32xf32>
      %c0_20 = arith.constant 0 : index
      %c0_21 = arith.constant 0 : index
      %28 = vector.load %arg6[%c0_20, %c0_21] : memref<4x32xf32, #tpu.memory_space<vmem>>, vector<4x32xf32>
      tpu.vector_store %arg6[%c0_20, %c0_21], %27 {strides = array<i32>} : memref<4x32xf32, #tpu.memory_space<vmem>>, vector<4x32xf32>,
    } else {
    }
    return
  }
  func.func @transform_0(%arg0: i32) -> (i32, i32, i32) {
    %c0_i32 = arith.constant 0 : i32
    %c0_i32_0 = arith.constant 0 : i32
    %c0_i32_1 = arith.constant 0 : i32
    return %arg0, %c0_i32, %c0_i32_0 : i32, i32, i32
  }
  func.func @transform_1(%arg0: i32) -> (i32, i32, i32) {
    %c0_i32 = arith.constant 0 : i32
    %c0_i32_0 = arith.constant 0 : i32
    %c0_i32_1 = arith.constant 0 : i32
    return %arg0, %c0_i32, %c0_i32_0 : i32, i32, i32
  }
  func.func @transform_2(%arg0: i32) -> (i32, i32, i32) {
    %c0_i32 = arith.constant 0 : i32
    %c0_i32_0 = arith.constant 0 : i32
    %c0_i32_1 = arith.constant 0 : i32
    return %arg0, %c0_i32, %c0_i32_0 : i32, i32, i32
  }
  func.func @transform_3(%arg0: i32) -> (i32, i32) {
    %c0_i32 = arith.constant 0 : i32
    %c0_i32_0 = arith.constant 0 : i32
    %c0_i32_1 = arith.constant 0 : i32
    return %c0_i32, %c0_i32_0 : i32, i32
  }
  func.func @transform_4(%arg0: i32) -> (i32, i32) {
    %c0_i32 = arith.constant 0 : i32
    %c0_i32_0 = arith.constant 0 : i32
    %c0_i32_1 = arith.constant 0 : i32
    return %c0_i32, %c0_i32_0 : i32, i32
  }
  func.func @transform_5(%arg0: i32) -> (i32, i32) {
    %c0_i32 = arith.constant 0 : i32
    %c0_i32_0 = arith.constant 0 : i32
    %c0_i32_1 = arith.constant 0 : i32
    return %c0_i32, %c0_i32_0 : i32, i32
  }
}

module attributes {stable_mosaic.version = 11 : i64} {
  func.func @_head_loss_kernel(%arg0: memref<4x32xf32, #tpu.memory_space<vmem>>, %arg1: memref<4x32xf32, #tpu.memory_space<vmem>>, %arg2: memref<32x32xbf16, #tpu.memory_space<vmem>>, %arg3: memref<1x32xf32, #tpu.memory_space<vmem>>, %arg4: memref<32x32xbf16, #tpu.memory_space<vmem>>, %arg5: memref<1x32xf32, #tpu.memory_space<vmem>>, %arg6: memref<1x1xf32, #tpu.memory_space<vmem>>) attributes {dimension_semantics = [], scalar_prefetch = 0 : i64, scratch_operands = 0 : i64, tpu.core_type = #tpu.core_type<tc>} {
    %c0 = arith.constant 0 : index
    %c0_0 = arith.constant 0 : index
    %0 = vector.load %arg0[%c0, %c0_0] : memref<4x32xf32, #tpu.memory_space<vmem>>, vector<4x32xf32>
    %1 = arith.truncf %0 : vector<4x32xf32> to vector<4x32xbf16>
    %c0_1 = arith.constant 0 : index
    %c0_2 = arith.constant 0 : index
    %2 = vector.load %arg2[%c0_1, %c0_2] : memref<32x32xbf16, #tpu.memory_space<vmem>>, vector<32x32xbf16>
    %cst = arith.constant dense<0.000000e+00> : vector<4x32xf32>
    %3 = tpu.matmul %1, %2, %cst {dimension_numbers = #tpu.dot_dimension_numbers<[1], [0], [0], [1], [0, 0, 1, 1], [], []>} : vector<4x32xbf16>, vector<32x32xbf16>, vector<4x32xf32> -> vector<4x32xf32>
    %c0_3 = arith.constant 0 : index
    %c0_4 = arith.constant 0 : index
    %4 = vector.load %arg3[%c0_3, %c0_4] : memref<1x32xf32, #tpu.memory_space<vmem>>, vector<1x32xf32>
    %5 = vector.broadcast %4 : vector<1x32xf32> to vector<4x32xf32>
    %6 = arith.addf %3, %5 : vector<4x32xf32>
    %cst_5 = arith.constant 0.000000e+00 : f32
    %7 = vector.broadcast %cst_5 : f32 to vector<4x32xf32>
    %8 = arith.maximumf %6, %7 : vector<4x32xf32>
    %9 = arith.truncf %8 : vector<4x32xf32> to vector<4x32xbf16>
    %c0_6 = arith.constant 0 : index
    %c0_7 = arith.constant 0 : index
    %10 = vector.load %arg4[%c0_6, %c0_7] : memref<32x32xbf16, #tpu.memory_space<vmem>>, vector<32x32xbf16>
    %cst_8 = arith.constant dense<0.000000e+00> : vector<4x32xf32>
    %11 = tpu.matmul %9, %10, %cst_8 {dimension_numbers = #tpu.dot_dimension_numbers<[1], [0], [0], [1], [0, 0, 1, 1], [], []>} : vector<4x32xbf16>, vector<32x32xbf16>, vector<4x32xf32> -> vector<4x32xf32>
    %c0_9 = arith.constant 0 : index
    %c0_10 = arith.constant 0 : index
    %12 = vector.load %arg5[%c0_9, %c0_10] : memref<1x32xf32, #tpu.memory_space<vmem>>, vector<1x32xf32>
    %13 = vector.broadcast %12 : vector<1x32xf32> to vector<4x32xf32>
    %14 = arith.addf %11, %13 : vector<4x32xf32>
    %c0_11 = arith.constant 0 : index
    %c0_12 = arith.constant 0 : index
    %15 = vector.load %arg1[%c0_11, %c0_12] : memref<4x32xf32, #tpu.memory_space<vmem>>, vector<4x32xf32>
    %16 = arith.mulf %14, %14 : vector<4x32xf32>
    %cst_13 = arith.constant dense<0.000000e+00> : vector<4xf32>
    %17 = vector.multi_reduction <add>, %16, %cst_13 [1] : vector<4x32xf32> to vector<4xf32>
    %18 = vector.shape_cast %17 : vector<4xf32> to vector<4x1xf32>
    %cst_14 = arith.constant 1.000000e-24 : f32
    %19 = vector.broadcast %cst_14 : f32 to vector<4x1xf32>
    %20 = arith.addf %18, %19 : vector<4x1xf32>
    %21 = math.rsqrt %20 : vector<4x1xf32>
    %22 = vector.broadcast %21 : vector<4x1xf32> to vector<4x32xf32>
    %23 = arith.mulf %14, %22 : vector<4x32xf32>
    %24 = arith.mulf %15, %15 : vector<4x32xf32>
    %cst_15 = arith.constant dense<0.000000e+00> : vector<4xf32>
    %25 = vector.multi_reduction <add>, %24, %cst_15 [1] : vector<4x32xf32> to vector<4xf32>
    %26 = vector.shape_cast %25 : vector<4xf32> to vector<4x1xf32>
    %cst_16 = arith.constant 1.000000e-24 : f32
    %27 = vector.broadcast %cst_16 : f32 to vector<4x1xf32>
    %28 = arith.addf %26, %27 : vector<4x1xf32>
    %29 = math.rsqrt %28 : vector<4x1xf32>
    %30 = vector.broadcast %29 : vector<4x1xf32> to vector<4x32xf32>
    %31 = arith.mulf %15, %30 : vector<4x32xf32>
    %32 = arith.mulf %23, %31 : vector<4x32xf32>
    %cst_17 = arith.constant dense<0.000000e+00> : vector<4xf32>
    %33 = vector.multi_reduction <add>, %32, %cst_17 [1] : vector<4x32xf32> to vector<4xf32>
    %34 = vector.shape_cast %33 : vector<4xf32> to vector<4x1xf32>
    %35 = vector.shape_cast %34 : vector<4x1xf32> to vector<1x4x1xf32>
    %cst_18 = arith.constant dense<0.000000e+00> : vector<1xf32>
    %36 = vector.multi_reduction <add>, %35, %cst_18 [1, 2] : vector<1x4x1xf32> to vector<1xf32>
    %37 = vector.shape_cast %36 : vector<1xf32> to vector<1x1x1xf32>
    %38 = vector.extract %37[0, 0, 0] : f32 from vector<1x1x1xf32>
    %39 = vector.broadcast %38 : f32 to vector<1x1xf32>
    %cst_19 = arith.constant 4.000000e+00 : f32
    %40 = vector.broadcast %cst_19 : f32 to vector<1x1xf32>
    %41 = arith.divf %39, %40 : vector<1x1xf32>
    %cst_20 = arith.constant 4.000000e+00 : f32
    %42 = vector.broadcast %cst_20 : f32 to vector<1x1xf32>
    %43 = arith.mulf %42, %41 : vector<1x1xf32>
    %cst_21 = arith.constant 4.000000e+00 : f32
    %44 = vector.broadcast %cst_21 : f32 to vector<1x1xf32>
    %45 = arith.subf %44, %43 : vector<1x1xf32>
    %c0_22 = arith.constant 0 : index
    %c0_23 = arith.constant 0 : index
    %46 = vector.load %arg6[%c0_22, %c0_23] : memref<1x1xf32, #tpu.memory_space<vmem>>, vector<1x1xf32>
    tpu.vector_store %arg6[%c0_22, %c0_23], %45 {strides = array<i32>} : memref<1x1xf32, #tpu.memory_space<vmem>>, vector<1x1xf32>,
    return
  }
}

</mosaic_0001>

<bundles_post_ra>
// kernel: run.6
= control target key start
LH: loop header
LB: loop body
LE: loop exit
PB: predicated region body
PF: predicated region fallthrough
CT: control target
= control target key end

     0   :  { %s457_s18 = smov 0   ;;  %s504_s0 = inlined_call_operand.vmem [shape: f32[2,4,8], index: 0, kind: input, shape index: {}]   ;;  %s505_s1 = inlined_call_operand.vmem [shape: bf16[2,8,32], index: 1, kind: input, shape index: {}]   ;;  %s506_s2 = inlined_call_operand.vmem [shape: f32[2,1,32], index: 2, kind: input, shape index: {}]   ;;  %s507_s3 = inlined_call_operand.vmem [shape: bf16[32,32], index: 3, kind: input, shape index: {}]   ;;  %s508_s4 = inlined_call_operand.vmem [shape: f32[1,32], index: 4, kind: input, shape index: {}]   ;;  %s509_s5 = inlined_call_operand.vmem [shape: f32[4,32], index: 5, kind: output, shape index: {}]  }
   0x1 LB: > { %s463_s19 = sadd.s32 4294967295, %s425_s18   ;;  %p388_p0 = scmp.ge.s32.totalorder %s425_s18, 1  ;;  %s425_s18 = sphi %s457_s18, %s15_s18  }
   0x2   : > { %p198_p1 = scmp.lt.s32.totalorder %s425_s18, 3 }
   0x4   : > { %p199_p2 = pnand %p388_p0, %p198_p1 }
   0x5   : > { %p227_p3 = scmp.lt.s32.totalorder (!%p199_p2), %s463_s19, 1  ;;  %p401_p4 = scmp.ne.s32.totalorder (!%p199_p2), %s463_s19, 0 }
   0x6   : > { %202 = sbr.rel (%p199_p2) target bundleno = 436 (0x1b4), region = 40 }
   0xb   : > { %s228_s20 = scalar_select %p227_p3, %s463_s19, 1  ;;  %vm250_vm0 = vcmask 1043456   ;;  %vm246_vm1 = vcmask 64512   ;;  %v406_v4 = vld [vmem:[%s507_s3 + $0x8] sm:$0xff]  ;;  %v405_v5 = vld [vmem:[%s507_s3] sm:$0xff]  ;;  %vm289_vm2 = vcmask 261120  }
   0xc   : > { %299 = vmatpush.bf16.msra.mxu1 %v406_v4  ;;  %v416_v12 = vld [vmem:[%s508_s4] ss:$0 sm:$0xff]  ;;  %vm307_vm3 = vcmask 257024  }
   0xd   : > { %s389_s21 = sshll.u32 %s228_s20, 2  ;;  %s237_s24 = scalar_lea.vmem %s506_s2, %s228_s20 }
   0xe   : > { %s230_s27 = scalar_lea.vmem %s504_s0, %s389_s21  ;;  %s234_s30 = scalar_lea.vmem %s505_s1, %s389_s21  ;;  %v415_v6 = vld [vmem:[%s237_s24] ss:$0 sm:$0xff] }
   0xf   : > { %v239_v0 = vld [vmem:[%s230_s27] sm:$0xf] }
  0x10   : > { %v241_v1 = vld [vmem:[%s234_s30] sm:$0xf]  ;;  %v240_v2 = vpack.c.bf16 %v239_v0, %v239_v0  ;;  %300 = vmatpush.bf16.msra.mxu1 %v405_v5 }
  0x11   : > { %v252_v3 = vsel %vm250_vm0, %v241_v1, 0 }
  0x12   : > { %261 = vmatpush.bf16.msra.mxu0 %v252_v3 }
  0x15   : > { %391 = vmatmul.msk.bf16.vlgmr.msra.gmra.mxu0 %vm246_vm1, %v240_v2 }
  0x92   : > { %v263_v7 = vpop.f32.mrf.mxu0 }
  0x93   : > { %v264_v8 = vadd.f32 %v415_v6, %v263_v7 }
  0x95   : > { %v267_v9 = vmax.f32 %v264_v8, 0.0 }
  0x97   : > { %v268_v10 = vpack.c.bf16 %v267_v9, %v267_v9 }
  0x99   : > { %400 = vmatmul.msk.bf16.vlgmr.msra.gmra.mxu1 %vm289_vm2, %v268_v10 }
  0x9a   : > { %v265_v11 = vpop.f32.mrf.mxu0 }
 0x116   : > { %v302_v13 = vpop.f32.mrf.mxu1 }
 0x117   : > { %v303_v14 = vadd.f32 %v416_v12, %v302_v13 }
 0x119   : > { %v306_v15 = vmul.f32 %v303_v14, %v303_v14 }
 0x11b   : > { %v308_v16 = vsel %vm307_vm3, %v306_v15, 0.0 }
 0x11c   : > { %309 = vadd.xlane.f32.xlu0 %v308_v16 }
 0x11e   : > { %v304_v17 = vpop.f32.mrf.mxu1 }
 0x18f   : > { %v310_v18 = vpop.xlane.xlu0 %309 }
 0x190   : > { %v311_v19 = vadd.f32 1e-24, %v310_v18 }
 0x192   : > { %417 = vrsqrt.f32 %v311_v19  ;;  %vm318_vm5 = vweird.f32 %v311_v19 }
 0x198   : > { %v418_v20 = vpop.eup %417 }
 0x199   : > { %v313_v21 = vmul.f32 %v418_v20, %v311_v19  ;;  %vm319_vm4 = vweird.f32 %v418_v20 }
 0x19a   : > { %vm320_vm6 = vmor %vm318_vm5, %vm319_vm4 }
 0x19b   : > { %v314_v22 = vmul.f32 %v418_v20, %v313_v21 }
 0x19d   : > { %v315_v23 = vmul.f32 0.5, %v314_v22 }
 0x19f   : > { %v316_v24 = vsub.f32 1.5, %v315_v23 }
 0x1a1   : > { %v317_v25 = vmul.f32 %v418_v20, %v316_v24 }
 0x1a2   : > { %327 = sbr.rel (%p401_p4) target bundleno = 425 (0x1a9), region = 44 }
 0x1a3   : > { %v321_v26 = vsel %vm320_vm6, %v418_v20, %v317_v25 }
 0x1a4   : > { %v322_v27 = vmul.f32 %v321_v26, %v303_v14 }
 0x1a6   : > { %v323_v28 = vmul.f32 0.5, %v322_v27 }
 0x1a8   : > { %328 = vst.msk [vmem:[%s509_s5] sm:$0xf] %vm307_vm3, %v323_v28 }
 0x1a9 PF: > { %p402_p5 = scmp.eq.s32.totalorder %s463_s19, 0 }
 0x1ab   : > { %332 = sbr.rel (%p402_p5) target bundleno = 436 (0x1b4), region = 48 }
 0x1b0   : > { %v333_v29 = vld [vmem:[%s509_s5] sm:$0xf] }
 0x1b1   : > { %v334_v30 = vadd.f32 %v333_v29, %v323_v28 }
 0x1b3   : > { %335 = vst.msk [vmem:[%s509_s5] sm:$0xf] %vm307_vm3, %v334_v30 }
 0x1b4 PF: > { %s15_s18 = sadd.s32 1, %s425_s18  }
 0x1b5   : > { %p12_p6 = scmp.ge.s32.totalorder %s15_s18, 4  }
 0x1b7   :  { %14 = sbr.rel (!%p12_p6) target bundleno = 1 (0x1), region = 80 }

// kernel: run.5
= control target key start
LH: loop header
LB: loop body
LE: loop exit
PB: predicated region body
PF: predicated region fallthrough
CT: control target
= control target key end

     0   :  { %s1209_s18 = smov 0   ;;  %s1211_s19 = smov 0   ;;  %s1547_s0 = inlined_call_operand.vmem [shape: f32[2,4,4,256], index: 0, kind: input, shape index: {}]   ;;  %s1548_s1 = inlined_call_operand.vmem [shape: bf16[2,8,4], index: 1, kind: input, shape index: {}]   ;;  %s1549_s2 = inlined_call_operand.vmem [shape: f32[2,8,1], index: 2, kind: input, shape index: {}, may-alias: {2,4}]   ;;  %s1550_s3 = inlined_call_operand.vmem [shape: f32[2,9,8,1], index: 3, kind: input, shape index: {}]   ;;  %s1551_s4 = inlined_call_operand.vmem [shape: f32[2,8,1], index: 4, kind: input, shape index: {}, may-alias: {2,4}]   ;;  %s1552_s5 = inlined_call_operand.vmem [shape: f32[2,2,1,2,8], index: 5, kind: output, shape index: {}]  }
   0x1   :  { %s1213_s20 = smov 0   ;;  %s1215_s21 = smov 0  }
   0x2   :  { %s1217_s22 = smov 0   ;;  %s1219_s23 = smov 0  }
   0x3   :  { %s1221_s24 = smov 0  }
   0x4 LB: > { %s30_s25 = sadd.s32 1, %s1159_s22  ;;  %s34_s26 = sadd.s32 1, %s1163_s23  ;;  %s1167_s24 = sphi %s1221_s24, %s15_s24   ;;  %s1163_s23 = sphi %s1219_s23, %s1566_s23   ;;  %s1159_s22 = sphi %s1217_s22, %s1565_s22   ;;  %s1155_s21 = sphi %s1215_s21, %s1564_s21   ;;  %s1151_s20 = sphi %s1213_s20, %s1563_s20   ;;  %s1147_s19 = sphi %s1211_s19, %s1562_s19   ;;  %s1143_s18 = sphi %s1209_s18, %s1561_s18  }
   0x5   : > { %p32_p0 = scmp.ge.s32.totalorder %s30_s25, 2  ;;  %s1018_s27 = sshll.u32 %s1159_s22, 1 }
   0x6   : > { %p54_p1 = scmp.ne.s32.totalorder %s1147_s19, %s1143_s18  ;;  %p55_p3 = scmp.eq.s32.totalorder %s1167_s24, 0 }
   0x7   : > { %s1568_s25 = smov (%p32_p0, %s30_s25), 0  ;;  %s1570_s26 = smov (!%p32_p0, %s34_s26), %s1163_s23 }
   0x8   : > { %p36_p2 = scmp.ge.s32.totalorder %s1570_s26, 2  ;;  %s39_s28 = sadd.s32 %s1163_s23, %s1018_s27 }
   0x9   : > { %s1019_s29 = sshll.u32 %s1568_s25, 1  ;;  %p56_p4 = por %p55_p3, %p54_p1 }
   0xa   : > { %s1572_s26 = smov (%p36_p2, %s1570_s26), 0  ;;  %s47_s7 = sadd.s32 1, %s1147_s19 }
   0xb   : > { %s41_s30 = sadd.s32 %s1019_s29, %s1572_s26  ;;  %p1021_p6 = scmp.ge.s32.totalorder %s1167_s24, 4 }
   0xc   : > { %s43_s6 = ssub.s32 %s39_s28, %s41_s30 }
   0xd   : > { %p45_p5 = scmp.eq.s32.totalorder %s43_s6, 0  ;;  %214 = sbr.rel (%p1021_p6) target bundleno = 24 (0x18), region = 16 }
   0xf   : > { %s1260_s8 = scalar_select %p45_p5, %s1147_s19, %s47_s7  }
  0x12   : > { %217 = sbr.rel (!%p56_p4) target bundleno = 24 (0x18), region = 20  ;;  %s219_s9 = sand.u32 (%p56_p4), 1, %s1147_s19  }
  0x13   : > { %s1040_s10 = sshll.u32 (%p56_p4), %s39_s28, 3  ;;  %s1022_s11 = sshll.u32 (%p56_p4), %s219_s9, 4 }
  0x14   : > { %s229_s14 = scalar_lea.vmem (%p56_p4), %s1547_s0, %s1040_s10  ;;  %s221_s15 = scalar_lea.vmem (%p56_p4), [#allocation2], %s1022_s11 }
  0x15   : > { %v260_v0 = vld [vmem:[%s229_s14] sm:$0xff] (%p56_p4) }
  0x16   : > { %v262_v1 = vld [vmem:[%s229_s14 + $0x20] sm:$0xff] (%p56_p4)  ;;  %261 = vst [vmem:[%s221_s15] sm:$0xff] (%p56_p4), %v260_v0 }
  0x17   : > { %263 = vst [vmem:[%s221_s15 + $0x8] sm:$0xff] %v262_v1 }
  0x18 PF: > { %p1026_p7 = scmp.ge.s32.totalorder %s1167_s24, 1  ;;  %p297_p8 = scmp.lt.s32.totalorder %s1167_s24, 5 }
  0x1a   : > { %p298_p9 = pnand %p1026_p7, %p297_p8 }
  0x1b   : > { %p357_p10 = scmp.lt.s32.totalorder (!%p298_p9), %s1155_s21, 1  ;;  %s304_s16 = sand.u32 (!%p298_p9), 1, %s1143_s18  }
  0x1c   : > { %301 = sbr.rel (%p298_p9) target bundleno = 519 (0x207), region = 74  ;;  %s1027_s17 = sshll.u32 (!%p298_p9), %s304_s16, 4 }
  0x1d   : > { %s306_s29 = scalar_lea.vmem (!%p298_p9), [#allocation2], %s1027_s17  ;;  %s1170_s15 = smov (!%p298_p9), 17  }
  0x1e   : > { %s1171_s16 = smov (!%p298_p9), 15   ;;  %s1172_s17 = smov (!%p298_p9), 16  }
  0x1f   : > { %s1175_s30 = smov (!%p298_p9), 112   ;;  %s1176_s6 = smov (!%p298_p9), 113  }
  0x20   : > { %p376_p11 = scmp.lt.s32.totalorder (!%p298_p9), %s1151_s20, 1 }
  0x21   : > { %v1169_v2 = vmov 0   ;;  %s1574_s21 = smov (!%p357_p10, %s1155_s21), 1  ;;  %v386_v3 = vld [vmem:[%s306_s29] sm:$0xff]  ;;  %v387_v4 = vld [vmem:[%s306_s29 + $0x8] sm:$0xff]  ;;  %vm413_vm0 = vcmask 1041408   ;;  %vm409_vm1 = vcmask 31744   ;;  %v506_v1 = vlaneseq }
  0x22   : > { %1108 = vset.pattern.permute.xlu0 %v1169_v2  ;;  %1110 = vset.pattern.permute.xlu1 %v1169_v2  ;;  %s1029_s27 = sshll.u32 %s1574_s21, 3  ;;  %s1041_s28 = smul.u32 72, %s1574_s21  ;;  %390 = vst [vmem:[#allocation1] ss:$2 sm:$0xff] %v386_v3  ;;  %vm545_vm2 = vcmask 138240   ;;  %vm585_vm4 = vcmask 130048  }
  0x23   : > { %1109 = vset.pattern.permute.xlu2 %v1169_v2  ;;  %s364_s18 = scalar_lea.vmem %s1549_s2, %s1029_s27  ;;  %394 = vst [vmem:[#allocation1 + $0x10] ss:$2 sm:$0xff] %v387_v4  ;;  %s1028_s11 = sshll.u32 %s1574_s21, 2  ;;  %v1368_v3 = vand.u32 127, %v506_v1  ;;  %vm615_vm5 = vcmask 121856   ;;  %vm655_vm8 = vcmask 7168  }
  0x24   : > { %v483_v5 = vld [vmem:[%s364_s18] sm:$0xff]  ;;  %s1284_s10 = scalar_lea.vmem %s1550_s3, %s1041_s28  ;;  %s360_s14 = scalar_lea.vmem %s1548_s1, %s1028_s11  ;;  %vm702_vm10 = vcmask 1039360   ;;  %vm736_vm11 = vcmask 924672   ;;  %vm800_vm12 = vcmask 908288   ;;  %vm770_vm13 = vcmask 916480  }
  0x25   : > { %486 = vperm.xlu0 %1108, %v483_v5   ;;  %v499_v6 = vld [vmem:[%s1284_s10 + $0x10] sm:$0xff]  ;;  %v403_v25 = vld [vmem:[%s360_s14] sm:$0xf]  ;;  %v504_v27 = vld [vmem:[%s1284_s10 + $0x38] sm:$0xff]  ;;  %s1173_s28 = smov 1   ;;  %s1174_s29 = smov 127  }
  0x26   : > { %v501_v26 = vld [vmem:[%s1284_s10 + $0x20] sm:$0xff]  ;;  %v498_v28 = vld [vmem:[%s1284_s10 + $0x8] sm:$0xff]  ;;  %v503_v30 = vld [vmem:[%s1284_s10 + $0x30] sm:$0xff]  ;;  %s1177_s18 = smov 111   ;;  %s373_s11 = scalar_lea.vmem %s1551_s4, %s1029_s27  ;;  %vm859_vm15 = vcmask 1041409  }
  0x27   : > { %v497_v29 = vld [vmem:[%s1284_s10] sm:$0xff]  ;;  %596 = vperm.xlu1 %1110, %v498_v28   ;;  %v500_v31 = vld [vmem:[%s1284_s10 + $0x18] sm:$0xff]  ;;  %v502_v32 = vld [vmem:[%s1284_s10 + $0x28] sm:$0xff]  ;;  %s1576_s20 = smov (!%p376_p11, %s1151_s20), 1  ;;  %s1032_s27 = sshll.u32 %s1574_s21, 1 }
  0x28   : > { %566 = vperm.xlu2 %1109, %v497_v29   ;;  %v505_v56 = vld [vmem:[%s1284_s10 + $0x40] sm:$0xff]  ;;  %s382_s10 = sadd.s32 %s1032_s27, %s1576_s20 }
  0x29   : > { %v391_v7 = vld.sshfl [vmem:[#allocation1] sm:$0xff pattern:$0x75316420]  ;;  %v392_v8 = vld.sshfl [vmem:[#allocation1 + $0x8] sm:$0xff pattern:$0x75316420] }
  0x2a   : > { %v401_v9 = vpack.c.bf16 %v392_v8, %v391_v7  ;;  %v395_v10 = vld.sshfl [vmem:[#allocation1 + $0x10] sm:$0xff pattern:$0x75316420]  ;;  %v396_v11 = vld.sshfl [vmem:[#allocation1 + $0x18] sm:$0xff pattern:$0x75316420] }
  0x2b   : > { %v402_v12 = vpack.c.bf16 %v396_v11, %v395_v10  ;;  %v826_v57 = vld [vmem:[%s373_s11] sm:$0xff]  ;;  %v508_v7 = vadd.s32 128, %v1368_v3  ;;  %s1033_s12 = sshll.u32 %s382_s10, 1 }
  0x2c   : > { %v405_v13 = vunpack.c.l.b16 %v401_v9  ;;  %v406_v14 = vunpack.c.h.b16 %v401_v9 }
  0x2d   : > { %636 = vperm.xlu0 %1108, %v499_v6   ;;  %v447_v15 = vunpack.c.l.b16 %v402_v12  ;;  %v448_v16 = vunpack.c.h.b16 %v402_v12  ;;  %v513_v6 = vand.u32 15, %v1368_v3  ;;  %v520_v12 = vand.u32 15, %v508_v7 }
  0x2e   : > { %v407_v17 = vpack.c.b16 %v405_v13, %v405_v13  ;;  %v408_v18 = vpack.c.b16 %v406_v14, %v406_v14 }
  0x2f   : > { %v449_v19 = vpack.c.b16 %v447_v15, %v447_v15  ;;  %v450_v20 = vpack.c.b16 %v448_v16, %v448_v16  ;;  %751 = vperm.xlu1 %1110, %v503_v30   ;;  %vm1374_vm3 = vcmp.ge.s32.totalorder %v513_v6, 1  ;;  %vm1382_vm6 = vcmp.lt.s32.totalorder %v513_v6, 15 }
  0x30   : > { %v415_v21 = vsel %vm413_vm0, %v407_v17, 0  ;;  %v418_v22 = vsel %vm413_vm0, %v408_v18, 0  ;;  %670 = vperm.xlu2 %1109, %v500_v31   ;;  %vm1388_vm7 = vcmp.ge.s32.totalorder %v520_v12, 1  ;;  %vm1405_vm9 = vcmp.lt.s32.totalorder %v520_v12, 15 }
  0x31   : > { %427 = vmatpush.bf16.msra.mxu0 %v415_v21  ;;  %440 = vmatpush.bf16.msra.mxu1 %v418_v22  ;;  %v452_v23 = vsel %vm413_vm0, %v449_v19, 0  ;;  %v455_v24 = vsel %vm413_vm0, %v450_v20, 0  ;;  %v1178_v15 = vmov 256.0   ;;  %vm862_vm0 = vcmask 58368  }
  0x32   : > { %464 = vmatpush.bf16.msra.mxu2 %v452_v23  ;;  %477 = vmatpush.bf16.msra.mxu3 %v455_v24  ;;  %1111 = vrcp.f32 %v1178_v15 }
  0x34   : > { %1034 = vmatmul.msk.bf16.vlgmr.msra.gmra.mxu0 %vm409_vm1, %v403_v25  ;;  %1035 = vmatmul.msk.bf16.vlgmr.msra.gmra.mxu1 %vm409_vm1, %v403_v25 }
  0x35   : > { %1036 = vmatmul.msk.bf16.vlgmr.msra.gmra.mxu2 %vm409_vm1, %v403_v25  ;;  %1037 = vmatmul.msk.bf16.vlgmr.msra.gmra.mxu3 %vm409_vm1, %v403_v25 }
  0x36   : > { %683 = vperm.xlu0 %1108, %v501_v26  }
  0x38   : > { %717 = vperm.xlu2 %1109, %v502_v32  }
  0x3e   : > { %781 = vperm.xlu0 %1108, %v504_v27  }
  0x82   : > { %v1335_v54 = vpop.permute.xlu2 %566 }
  0x8a   : > { %v1341_v55 = vpop.permute.xlu2 %670 }
  0x92   : > { %v1356_v58 = vpop.permute.xlu2 %717 }
  0x97   : > { %v487_v33 = vpop.permute.xlu0 %486 }
  0x99   : > { %v1360_v60 = vpop.permute.xlu1 %596 }
  0x9f   : > { %v1298_v34 = vpop.permute.xlu0 %636 }
  0xa1   : > { %v1362_v62 = vpop.permute.xlu1 %751 }
  0xa8   : > { %v1300_v41 = vpop.permute.xlu0 %683 }
  0xb0   : > { %v1364_v63 = vpop.permute.xlu0 %781 }
  0xb1   : > { %v429_v35 = vpop.f32.mrf.mxu0  ;;  %v442_v36 = vpop.f32.mrf.mxu1 }
  0xb2   : > { %v489_v37 = vadd.f32 %v487_v33, %v429_v35  ;;  %v490_v38 = vadd.f32 %v487_v33, %v442_v36 }
  0xb4   : > { %v493_v39 = vmax.f32 %v489_v37, 0.0  ;;  %v494_v40 = vmax.f32 %v490_v38, 0.0 }
  0xb6   : > { %539 = vrot.lane.b32.xlu1 %v494_v40, %s1170_s15  ;;  %607 = vrot.lane.b32.xlu2 %v493_v39, %s1171_s16  ;;  %v1305_v42 = vmul.f32 %v1300_v41, %v493_v39  ;;  %v1308_v43 = vmul.f32 %v1300_v41, %v494_v40 }
  0xb7   : > { %537 = vrot.lane.b32.xlu0 %v493_v39, %s1170_s15 }
  0xb8   : > { %v466_v44 = vpop.f32.mrf.mxu2  ;;  %v479_v45 = vpop.f32.mrf.mxu3 }
  0xb9   : > { %v444_v46 = vpop.f32.mrf.mxu1  ;;  %v431_v47 = vpop.f32.mrf.mxu0  ;;  %v492_v50 = vadd.f32 %v487_v33, %v479_v45  ;;  %v491_v52 = vadd.f32 %v487_v33, %v466_v44 }
  0xbb   : > { %v1317_v51 = vmax.f32 %v492_v50, 0.0  ;;  %v1323_v53 = vmax.f32 %v491_v52, 0.0 }
  0xbe   : > { %579 = vrot.lane.b32.xlu1 %v494_v40, %s1172_s17  ;;  %649 = vrot.lane.b32.xlu2 %v494_v40, %s1173_s28 }
  0xbf   : > { %577 = vrot.lane.b32.xlu0 %v493_v39, %s1172_s17 }
  0xc0   : > { %v468_v48 = vpop.f32.mrf.mxu2  ;;  %v481_v49 = vpop.f32.mrf.mxu3 }
  0xc6   : > { %647 = vrot.lane.b32.xlu1 %v493_v39, %s1173_s28  ;;  %696 = vrot.lane.b32.xlu2 %v494_v40, %s1174_s29 }
  0xc7   : > { %609 = vrot.lane.b32.xlu0 %v494_v40, %s1171_s16 }
  0xce   : > { %694 = vrot.lane.b32.xlu1 %v493_v39, %s1174_s29  ;;  %762 = vrot.lane.b32.xlu2 %v493_v39, %s1175_s30 }
  0xcf   : > { %728 = vrot.lane.b32.xlu0 %v493_v39, %s1176_s6 }
  0xd6   : > { %730 = vrot.lane.b32.xlu1 %v494_v40, %s1176_s6  ;;  %794 = vrot.lane.b32.xlu2 %v494_v40, %s1177_s18 }
  0xd7   : > { %764 = vrot.lane.b32.xlu0 %v494_v40, %s1175_s30 }
  0xde   : > { %792 = vrot.lane.b32.xlu1 %v493_v39, %s1177_s18  ;;  %543 = vrot.lane.b32.xlu2 %v1317_v51, %s1170_s15 }
  0xdf   : > { %583 = vrot.lane.b32.xlu0 %v1317_v51, %s1172_s17 }
  0xe6   : > { %541 = vrot.lane.b32.xlu1 %v1323_v53, %s1170_s15  ;;  %581 = vrot.lane.b32.xlu2 %v1323_v53, %s1172_s17  ;;  %s384_s15 = scalar_lea.vmem %s1552_s5, %s1033_s12 }
  0xe7   : > { %651 = vrot.lane.b32.xlu0 %v1323_v53, %s1173_s28 }
  0xee   : > { %611 = vrot.lane.b32.xlu1 %v1323_v53, %s1171_s16  ;;  %613 = vrot.lane.b32.xlu2 %v1317_v51, %s1171_s16 }
  0xef   : > { %698 = vrot.lane.b32.xlu0 %v1323_v53, %s1174_s29 }
  0xf6   : > { %653 = vrot.lane.b32.xlu1 %v1317_v51, %s1173_s28  ;;  %732 = vrot.lane.b32.xlu2 %v1323_v53, %s1176_s6 }
  0xf7   : > { %734 = vrot.lane.b32.xlu0 %v1317_v51, %s1176_s6 }
  0xfe   : > { %700 = vrot.lane.b32.xlu1 %v1317_v51, %s1174_s29  ;;  %768 = vrot.lane.b32.xlu2 %v1317_v51, %s1175_s30 }
  0xff   : > { %796 = vrot.lane.b32.xlu0 %v1323_v53, %s1177_s18 }
 0x106   : > { %766 = vrot.lane.b32.xlu1 %v1323_v53, %s1175_s30  ;;  %815 = vperm.xlu2 %1109, %v505_v56  }
 0x107   : > { %829 = vperm.xlu0 %1108, %v826_v57  }
 0x10e   : > { %798 = vrot.lane.b32.xlu1 %v1317_v51, %s1177_s18 }
 0x110   : > { %v608_v59 = vpop.permute.xlu2 %607 }
 0x111   : > { %v622_v16 = vsel %vm615_vm5, 0.0, %v608_v59 }
 0x112   : > { %v630_v23 = vsel %vm1382_vm6, %v622_v16, 0.0 }
 0x113   : > { %v639_v28 = vmul.f32 %v1298_v34, %v630_v23 }
 0x118   : > { %v650_v61 = vpop.permute.xlu2 %649 }
 0x120   : > { %v1366_v0 = vpop.permute.xlu2 %696 }
 0x128   : > { %v540_v2 = vpop.permute.xlu1 %539  ;;  %v1370_v5 = vpop.permute.xlu2 %762 }
 0x129   : > { %v538_v4 = vpop.permute.xlu0 %537 }
 0x12a   : > { %v552_v9 = vsel %vm545_vm2, 0.0, %v538_v4  ;;  %v546_v19 = vsel %vm545_vm2, %v538_v4, %v540_v2 }
 0x12b   : > { %v560_v13 = vsel %vm1374_vm3, %v552_v9, 0.0  ;;  %v561_v24 = vsel %vm1388_vm7, %v546_v19, 0.0 }
 0x12c   : > { %v569_v20 = vmul.f32 %v1335_v54, %v560_v13  ;;  %v570_v33 = vmul.f32 %v1335_v54, %v561_v24 }
 0x130   : > { %v580_v10 = vpop.permute.xlu1 %579  ;;  %v1394_v21 = vpop.permute.xlu2 %794 }
 0x131   : > { %v578_v11 = vpop.permute.xlu0 %577 }
 0x132   : > { %v592_v14 = vsel %vm585_vm4, 0.0, %v578_v11  ;;  %v586_v22 = vsel %vm585_vm4, %v578_v11, %v580_v10 }
 0x133   : > { %v599_v17 = vmul.f32 %v1360_v60, %v592_v14  ;;  %v600_v26 = vmul.f32 %v1360_v60, %v586_v22 }
 0x135   : > { %v603_v25 = vadd.f32 %v599_v17, %v569_v20  ;;  %v604_v44 = vadd.f32 %v600_v26, %v570_v33 }
 0x137   : > { %v643_v37 = vadd.f32 %v639_v28, %v603_v25  ;;  %v807_v28 = vsel %vm800_vm12, %v1394_v21, 0.0 }
 0x138   : > { %v648_v27 = vpop.permute.xlu1 %647  ;;  %v544_v49 = vpop.permute.xlu2 %543 }
 0x139   : > { %v656_v29 = vsel %vm655_vm8, %v648_v27, %v650_v61  ;;  %v662_v30 = vsel %vm655_vm8, 0.0, %v648_v27  ;;  %v610_v31 = vpop.permute.xlu0 %609 }
 0x13a   : > { %v664_v35 = vsel %vm1374_vm3, %v662_v30, 0.0  ;;  %v616_v36 = vsel %vm615_vm5, %v608_v59, %v610_v31  ;;  %v665_v38 = vsel %vm1388_vm7, %v656_v29, 0.0 }
 0x13b   : > { %v673_v39 = vmul.f32 %v1341_v55, %v664_v35  ;;  %v631_v40 = vsel %vm1405_vm9, %v616_v36, 0.0  ;;  %v674_v47 = vmul.f32 %v1341_v55, %v665_v38 }
 0x13c   : > { %v640_v45 = vmul.f32 %v1298_v34, %v631_v40 }
 0x13d   : > { %v677_v46 = vadd.f32 %v673_v39, %v643_v37 }
 0x13e   : > { %v644_v48 = vadd.f32 %v640_v45, %v604_v44  ;;  %v810_v44 = vsel %vm1405_vm9, %v807_v28, 0.0 }
 0x13f   : > { %v690_v50 = vadd.f32 %v1305_v42, %v677_v46  ;;  %v709_v42 = vsel %vm702_vm10, %v1366_v0, 0.0 }
 0x140   : > { %v678_v52 = vadd.f32 %v674_v47, %v644_v48  ;;  %v695_v56 = vpop.permute.xlu1 %694  ;;  %v582_v1 = vpop.permute.xlu2 %581 }
 0x141   : > { %v729_v57 = vpop.permute.xlu0 %728  ;;  %v703_v14 = vsel %vm702_vm10, %v695_v56, %v1366_v0  ;;  %v593_v29 = vsel %vm585_vm4, 0.0, %v582_v1 }
 0x142   : > { %v691_v59 = vadd.f32 %v1308_v43, %v678_v52  ;;  %v712_v43 = vsel %vm1405_vm9, %v709_v42, 0.0  ;;  %v711_v25 = vsel %vm1382_vm6, %v703_v14, 0.0  ;;  %v601_v45 = vmul.f32 %v1360_v60, %v593_v29 }
 0x143   : > { %v721_v24 = vmul.f32 %v1356_v58, %v712_v43  ;;  %v720_v37 = vmul.f32 %v1356_v58, %v711_v25 }
 0x148   : > { %v731_v61 = vpop.permute.xlu1 %730  ;;  %v614_v7 = vpop.permute.xlu2 %613 }
 0x149   : > { %v765_v2 = vpop.permute.xlu0 %764  ;;  %v737_v20 = vsel %vm736_vm11, %v729_v57, %v731_v61  ;;  %v743_v22 = vsel %vm736_vm11, %v731_v61, 0.0 }
 0x14a   : > { %v745_v33 = vsel %vm1374_vm3, %v737_v20, 0.0  ;;  %v746_v35 = vsel %vm1388_vm7, %v743_v22, 0.0  ;;  %v771_v52 = vsel %vm770_vm13, %v1370_v5, %v765_v2 }
 0x14b   : > { %v754_v48 = vmul.f32 %v1362_v62, %v745_v33 }
 0x150   : > { %v793_v4 = vpop.permute.xlu1 %792  ;;  %v1422_v11 = vpop.permute.xlu2 %732 }
 0x151   : > { %v584_v6 = vpop.permute.xlu0 %583 }
 0x152   : > { %v587_v38 = vsel %vm585_vm4, %v582_v1, %v584_v6 }
 0x153   : > { %v602_v57 = vmul.f32 %v1360_v60, %v587_v38 }
 0x158   : > { %v542_v9 = vpop.permute.xlu1 %541  ;;  %v1432_v19 = vpop.permute.xlu2 %768 }
 0x159   : > { %v652_v10 = vpop.permute.xlu0 %651  ;;  %v547_v16 = vsel %vm545_vm2, %v542_v9, %v544_v49  ;;  %v553_v17 = vsel %vm545_vm2, 0.0, %v542_v9  ;;  %v755_v49 = vmul.f32 %v1362_v62, %v746_v35  ;;  %v777_v9 = vsel %vm770_vm13, %v765_v2, 0.0 }
 0x15a   : > { %v562_v30 = vsel %vm1374_vm3, %v553_v17, 0.0  ;;  %v563_v31 = vsel %vm1388_vm7, %v547_v16, 0.0  ;;  %v663_v61 = vsel %vm655_vm8, 0.0, %v652_v10  ;;  %v785_v22 = vmul.f32 %v1364_v63, %v777_v9 }
 0x15b   : > { %v571_v46 = vmul.f32 %v1335_v54, %v562_v30  ;;  %v572_v47 = vmul.f32 %v1335_v54, %v563_v31  ;;  %v725_v54 = vadd.f32 %v721_v24, %v691_v59 }
 0x15d   : > { %v605_v5 = vadd.f32 %v601_v45, %v571_v46  ;;  %v606_v43 = vadd.f32 %v602_v57, %v572_v47  ;;  %v759_v20 = vadd.f32 %v755_v49, %v725_v54 }
 0x15f   : > { %v789_v29 = vadd.f32 %v785_v22, %v759_v20 }
 0x160   : > { %v612_v12 = vpop.permute.xlu1 %611  ;;  %v816_v14 = vpop.permute.xlu2 %815 }
 0x161   : > { %v699_v13 = vpop.permute.xlu0 %698  ;;  %v617_v26 = vsel %vm615_vm5, %v612_v12, %v614_v7  ;;  %v623_v0 = vsel %vm615_vm5, 0.0, %v612_v12  ;;  %v724_v7 = vadd.f32 %v720_v37, %v690_v50  ;;  %v801_v12 = vsel %vm800_vm12, %v793_v4, %v1394_v21 }
 0x162   : > { %v632_v39 = vsel %vm1382_vm6, %v623_v0, 0.0  ;;  %v633_v40 = vsel %vm1405_vm9, %v617_v26, 0.0  ;;  %v666_v50 = vsel %vm1374_vm3, %v663_v61, 0.0  ;;  %v809_v59 = vsel %vm1382_vm6, %v801_v12, 0.0 }
 0x163   : > { %v641_v1 = vmul.f32 %v1298_v34, %v632_v39  ;;  %v642_v6 = vmul.f32 %v1298_v34, %v633_v40  ;;  %v758_v17 = vadd.f32 %v754_v48, %v724_v7  ;;  %v784_v34 = vmul.f32 %v1364_v63, %v771_v52 }
 0x164   : > { %v819_v24 = vmul.f32 %v816_v14, %v810_v44  ;;  %v675_v26 = vmul.f32 %v1341_v55, %v666_v50  ;;  %v688_v39 = vmul.f32 %v1300_v41, %v1323_v53  ;;  %v1112_v50 = vpop.eup %1111 }
 0x165   : > { %v645_v21 = vadd.f32 %v641_v1, %v605_v5  ;;  %v646_v2 = vadd.f32 %v642_v6, %v606_v43  ;;  %v788_v28 = vadd.f32 %v784_v34, %v758_v17  ;;  %v847_v32 = vmul.f32 256.0, %v1112_v50 }
 0x166   : > { %v823_v37 = vadd.f32 %v819_v24, %v789_v29  ;;  %vm851_vm14 = vweird.f32 %v1112_v50 }
 0x167   : > { %v679_v31 = vadd.f32 %v675_v26, %v645_v21 }
 0x168   : > { %v654_v23 = vpop.permute.xlu1 %653 }
 0x169   : > { %v735_v27 = vpop.permute.xlu0 %734  ;;  %v657_v36 = vsel %vm655_vm8, %v652_v10, %v654_v23  ;;  %v818_v23 = vmul.f32 %v816_v14, %v809_v59  ;;  %v692_v48 = vadd.f32 %v688_v39, %v679_v31  ;;  %v848_v59 = vsub.f32 1.0, %v847_v32 }
 0x16a   : > { %v667_v56 = vsel %vm1388_vm7, %v657_v36, 0.0  ;;  %v744_v33 = vsel %vm736_vm11, %v735_v27, 0.0 }
 0x16b   : > { %v676_v16 = vmul.f32 %v1341_v55, %v667_v56  ;;  %v822_v38 = vadd.f32 %v818_v23, %v788_v28  ;;  %v738_v55 = vsel %vm736_vm11, %v1422_v11, %v735_v27  ;;  %v748_v46 = vsel %vm1388_vm7, %v744_v33, 0.0 }
 0x16c   : > { %v747_v52 = vsel %vm1374_vm3, %v738_v55, 0.0  ;;  %v849_v21 = vmul.f32 %v1112_v50, %v848_v59 }
 0x16d   : > { %v680_v0 = vadd.f32 %v676_v16, %v646_v2  ;;  %v756_v57 = vmul.f32 %v1362_v62, %v747_v52 }
 0x16e   : > { %v850_v2 = vadd.f32 %v1112_v50, %v849_v21 }
 0x170   : > { %v701_v42 = vpop.permute.xlu1 %700 }
 0x171   : > { %v710_v60 = vsel %vm702_vm10, %v701_v42, 0.0  ;;  %v797_v10 = vpop.permute.xlu0 %796  ;;  %v704_v4 = vsel %vm702_vm10, %v699_v13, %v701_v42  ;;  %v689_v13 = vmul.f32 %v1300_v41, %v1317_v51  ;;  %v757_v41 = vmul.f32 %v1362_v62, %v748_v46 }
 0x172   : > { %v714_v25 = vsel %vm1405_vm9, %v710_v60, 0.0  ;;  %v713_v30 = vsel %vm1382_vm6, %v704_v4, 0.0 }
 0x173   : > { %v723_v35 = vmul.f32 %v1356_v58, %v714_v25  ;;  %v693_v40 = vadd.f32 %v689_v13, %v680_v0  ;;  %v722_v44 = vmul.f32 %v1356_v58, %v713_v30  ;;  %v778_v58 = vsel %vm770_vm13, %v1432_v19, 0.0 }
 0x174   : > { %v787_v6 = vmul.f32 %v1364_v63, %v778_v58 }
 0x175   : > { %v727_v49 = vadd.f32 %v723_v35, %v693_v40  ;;  %v726_v53 = vadd.f32 %v722_v44, %v692_v48 }
 0x177   : > { %v761_v61 = vadd.f32 %v757_v41, %v727_v49  ;;  %v760_v7 = vadd.f32 %v756_v57, %v726_v53 }
 0x178   : > { %v767_v36 = vpop.permute.xlu1 %766 }
 0x179   : > { %v830_v45 = vpop.permute.xlu0 %829  ;;  %v772_v11 = vsel %vm770_vm13, %v767_v36, %v1432_v19  ;;  %v791_v62 = vadd.f32 %v787_v6, %v761_v61 }
 0x17a   : > { %v832_v47 = vadd.f32 %v830_v45, %v822_v38  ;;  %v833_v51 = vadd.f32 %v830_v45, %v823_v37  ;;  %v786_v1 = vmul.f32 %v1364_v63, %v772_v11 }
 0x17c   : > { %v836_v27 = vmax.f32 %v832_v47, 0.0  ;;  %v837_v56 = vmax.f32 %v833_v51, 0.0  ;;  %v790_v42 = vadd.f32 %v786_v1, %v760_v7 }
 0x17e   : > { %v840_v18 = vadd.f32 %v837_v56, %v836_v27 }
 0x180   : > { %841 = vadd.xlane.f32.xlu1 %v840_v18  ;;  %v799_v8 = vpop.permute.xlu1 %798 }
 0x181   : > { %v802_v54 = vsel %vm800_vm12, %v797_v10, %v799_v8  ;;  %v808_v9 = vsel %vm800_vm12, %v799_v8, 0.0 }
 0x182   : > { %v811_v12 = vsel %vm1382_vm6, %v802_v54, 0.0  ;;  %v812_v19 = vsel %vm1405_vm9, %v808_v9, 0.0 }
 0x183   : > { %v820_v5 = vmul.f32 %v816_v14, %v811_v12  ;;  %v821_v43 = vmul.f32 %v816_v14, %v812_v19  ;;  %v852_v14 = vsel %vm851_vm14, %v1112_v50, %v850_v2 }
 0x185   : > { %v824_v16 = vadd.f32 %v820_v5, %v790_v42  ;;  %v825_v60 = vadd.f32 %v821_v43, %v791_v62 }
 0x187   : > { %v834_v63 = vadd.f32 %v830_v45, %v824_v16  ;;  %v835_v17 = vadd.f32 %v830_v45, %v825_v60 }
 0x189   : > { %v838_v10 = vmax.f32 %v834_v63, 0.0  ;;  %v839_v20 = vmax.f32 %v835_v17, 0.0 }
 0x18b   : > { %v843_v34 = vadd.f32 %v839_v20, %v838_v10 }
 0x18d   : > { %844 = vadd.xlane.f32.xlu2 %v843_v34 }
 0x1f3   : > { %v842_v4 = vpop.xlane.xlu1 %841 }
 0x1f4   : > { %v853_v22 = vmul.f32 %v852_v14, %v842_v4 }
 0x1f6   : > { %v857_v25 = vperm.slane %v853_v22, %v1368_v3 }
 0x200   : > { %v845_v23 = vpop.xlane.xlu2 %844 }
 0x201   : > { %v854_v24 = vmul.f32 %v852_v14, %v845_v23 }
 0x203   : > { %v858_v26 = vperm.slane %v854_v24, %v1368_v3 }
 0x205   : > { %v860_v0 = vsel %vm859_vm15, %v858_v26, %v857_v25 }
 0x206   : > { %863 = vst.msk [vmem:[%s384_s15] sm:$0x3] %vm862_vm0, %v860_v0 }
 0x207 PF: > { %s15_s24 = sadd.s32 1, %s1167_s24   ;;  %s1561_s18 = smov %s1147_s19 }
 0x208   : > { %p12_p12 = scmp.ge.s32.totalorder %s15_s24, 6   ;;  %s1562_s19 = smov %s1260_s8 }
 0x209   : > { %s1563_s20 = smov %s1159_s22  ;;  %s1564_s21 = smov %s1163_s23 }
 0x20a   : > { %s1565_s22 = smov %s1568_s25  ;;  %s1566_s23 = smov %s1572_s26 }
 0x20b   :  { %14 = sbr.rel (!%p12_p12) target bundleno = 4 (0x4), region = 126 }

// kernel: run.7
= control target key start
LH: loop header
LB: loop body
LE: loop exit
PB: predicated region body
PF: predicated region fallthrough
CT: control target
= control target key end

     0   :  { %s1180_s18 = smov 0   ;;  %s1182_s19 = smov 0   ;;  %s1494_s0 = inlined_call_operand.vmem [shape: f32[2,4,4,256], index: 0, kind: input, shape index: {}]   ;;  %s1495_s1 = inlined_call_operand.vmem [shape: bf16[1,8,4], index: 1, kind: input, shape index: {}]   ;;  %s1496_s2 = inlined_call_operand.vmem [shape: f32[1,8,1], index: 2, kind: input, shape index: {}, may-alias: {2,4}]   ;;  %s1497_s3 = inlined_call_operand.vmem [shape: f32[1,9,8,1], index: 3, kind: input, shape index: {}]   ;;  %s1498_s4 = inlined_call_operand.vmem [shape: f32[1,8,1], index: 4, kind: input, shape index: {}, may-alias: {2,4}]   ;;  %s1499_s5 = inlined_call_operand.vmem [shape: f32[1,2,1,2,8], index: 5, kind: output, shape index: {}]  }
   0x1   :  { %s1184_s20 = smov 0   ;;  %s1186_s21 = smov 0  }
   0x2   :  { %s1188_s22 = smov 0  }
   0x3 LB: > { %s30_s23 = sadd.s32 1, %s1134_s21  ;;  %s1022_s24 = sshll.u32 %s1134_s21, 1  ;;  %s1138_s22 = sphi %s1188_s22, %s15_s22   ;;  %s1134_s21 = sphi %s1186_s21, %s1511_s21   ;;  %s1130_s20 = sphi %s1184_s20, %s1510_s20   ;;  %s1126_s19 = sphi %s1182_s19, %s1509_s19   ;;  %s1122_s18 = sphi %s1180_s18, %s1508_s18  }
   0x4   : > { %p32_p0 = scmp.ge.s32.totalorder %s30_s23, 2  ;;  %p52_p1 = scmp.ne.s32.totalorder %s1126_s19, %s1122_s18 }
   0x5   : > { %p53_p2 = scmp.eq.s32.totalorder %s1138_s22, 0  ;;  %s45_s27 = sadd.s32 1, %s1126_s19 }
   0x6   : > { %s1513_s23 = smov (%p32_p0, %s30_s23), 0  ;;  %p1029_p5 = scmp.ge.s32.totalorder %s1138_s22, 2 }
   0x7   : > { %p54_p3 = por %p53_p2, %p52_p1  ;;  %s1023_s25 = sshll.u32 %s1513_s23, 1 }
   0x8   : > { %s41_s26 = ssub.s32 %s1022_s24, %s1023_s25  ;;  %241 = sbr.rel (%p1029_p5) target bundleno = 19 (0x13), region = 32 }
   0x9   : > { %p43_p4 = scmp.eq.s32.totalorder %s41_s26, 0 }
   0xb   : > { %s1215_s28 = scalar_select %p43_p4, %s1126_s19, %s45_s27  }
   0xd   : > { %244 = sbr.rel (!%p54_p3) target bundleno = 19 (0x13), region = 36  ;;  %s246_s29 = sand.u32 (%p54_p3), 1, %s1126_s19  }
   0xe   : > { %s1044_s30 = sshll.u32 (%p54_p3), %s1134_s21, 4  ;;  %s1030_s6 = sshll.u32 (%p54_p3), %s246_s29, 4 }
   0xf   : > { %s255_s9 = scalar_lea.vmem (%p54_p3), %s1494_s0, %s1044_s30  ;;  %s248_s10 = scalar_lea.vmem (%p54_p3), [#allocation2], %s1030_s6 }
  0x10   : > { %v286_v0 = vld [vmem:[%s255_s9] sm:$0xff] (%p54_p3) }
  0x11   : > { %v288_v1 = vld [vmem:[%s255_s9 + $0x20] sm:$0xff] (%p54_p3)  ;;  %287 = vst [vmem:[%s248_s10] sm:$0xff] (%p54_p3), %v286_v0 }
  0x12   : > { %289 = vst [vmem:[%s248_s10 + $0x8] sm:$0xff] %v288_v1 }
  0x13 PF: > { %p1034_p6 = scmp.ge.s32.totalorder %s1138_s22, 1  ;;  %p294_p7 = scmp.lt.s32.totalorder %s1138_s22, 3 }
  0x15   : > { %p295_p8 = pnand %p1034_p6, %p294_p7 }
  0x16   : > { %s301_s13 = sand.u32 (!%p295_p8), 1, %s1122_s18   ;;  %s1142_s16 = smov (!%p295_p8), 15  }
  0x17   : > { %298 = sbr.rel (%p295_p8) target bundleno = 514 (0x202), region = 74  ;;  %s1035_s14 = sshll.u32 (!%p295_p8), %s301_s13, 4 }
  0x18   : > { %s303_s15 = scalar_lea.vmem (!%p295_p8), [#allocation2], %s1035_s14  ;;  %s1143_s17 = smov (!%p295_p8), 16  }
  0x19   : > { %s1144_s18 = smov (!%p295_p8), 1   ;;  %s1145_s24 = smov (!%p295_p8), 127  }
  0x1a   : > { %s1146_s25 = smov (!%p295_p8), 112   ;;  %s1147_s26 = smov (!%p295_p8), 113  }
  0x1b   : > { %s1148_s27 = smov (!%p295_p8), 111   ;;  %p372_p9 = scmp.lt.s32.totalorder (!%p295_p8), %s1130_s20, 1 }
  0x1c   : > { %v479_v2 = vld [vmem:[%s1496_s2] sm:$0xff]  ;;  %v1140_v3 = vmov 0   ;;  %v382_v4 = vld [vmem:[%s303_s15] sm:$0xff]  ;;  %v495_v6 = vld [vmem:[%s1497_s3 + $0x10] sm:$0xff]  ;;  %vm409_vm0 = vcmask 1041408   ;;  %vm405_vm1 = vcmask 31744   ;;  %v502_v1 = vlaneseq }
  0x1d   : > { %1095 = vset.pattern.permute.xlu0 %v1140_v3  ;;  %1097 = vset.pattern.permute.xlu1 %v1140_v3  ;;  %v383_v5 = vld [vmem:[%s303_s15 + $0x8] sm:$0xff]  ;;  %386 = vst [vmem:[#allocation1] ss:$2 sm:$0xff] %v382_v4  ;;  %v500_v27 = vld [vmem:[%s1497_s3 + $0x38] sm:$0xff]  ;;  %v494_v28 = vld [vmem:[%s1497_s3 + $0x8] sm:$0xff]  ;;  %s1141_s15 = smov 17  }
  0x1e   : > { %482 = vperm.xlu0 %1095, %v479_v2   ;;  %1096 = vset.pattern.permute.xlu2 %v1140_v3  ;;  %390 = vst [vmem:[#allocation1 + $0x10] ss:$2 sm:$0xff] %v383_v5  ;;  %v497_v17 = vld [vmem:[%s1497_s3 + $0x20] sm:$0xff]  ;;  %v499_v30 = vld [vmem:[%s1497_s3 + $0x30] sm:$0xff]  ;;  %v496_v31 = vld [vmem:[%s1497_s3 + $0x18] sm:$0xff]  ;;  %v1322_v3 = vand.u32 127, %v502_v1 }
  0x1f   : > { %v399_v26 = vld [vmem:[%s1495_s1] sm:$0xf]  ;;  %592 = vperm.xlu1 %1097, %v494_v28   ;;  %v498_v32 = vld [vmem:[%s1497_s3 + $0x28] sm:$0xff]  ;;  %vm541_vm2 = vcmask 138240   ;;  %vm581_vm4 = vcmask 130048   ;;  %vm611_vm5 = vcmask 121856  }
  0x20   : > { %v493_v29 = vld [vmem:[%s1497_s3] sm:$0xff]  ;;  %vm651_vm8 = vcmask 7168   ;;  %vm698_vm10 = vcmask 1039360   ;;  %vm732_vm11 = vcmask 924672   ;;  %vm796_vm12 = vcmask 908288   ;;  %s1515_s20 = smov (!%p372_p9, %s1130_s20), 1 }
  0x21   : > { %562 = vperm.xlu2 %1096, %v493_v29   ;;  %v501_v56 = vld [vmem:[%s1497_s3 + $0x40] sm:$0xff]  ;;  %vm766_vm13 = vcmask 916480   ;;  %s1036_s8 = sshll.u32 %s1515_s20, 1  ;;  %vm855_vm15 = vcmask 1041409  }
  0x22   : > { %v822_v57 = vld [vmem:[%s1498_s4] sm:$0xff]  ;;  %s380_s11 = scalar_lea.vmem %s1499_s5, %s1036_s8 }
  0x24   : > { %v387_v7 = vld.sshfl [vmem:[#allocation1] sm:$0xff pattern:$0x75316420]  ;;  %v388_v8 = vld.sshfl [vmem:[#allocation1 + $0x8] sm:$0xff pattern:$0x75316420] }
  0x25   : > { %v397_v9 = vpack.c.bf16 %v388_v8, %v387_v7  ;;  %v391_v10 = vld.sshfl [vmem:[#allocation1 + $0x10] sm:$0xff pattern:$0x75316420]  ;;  %v392_v11 = vld.sshfl [vmem:[#allocation1 + $0x18] sm:$0xff pattern:$0x75316420] }
  0x26   : > { %632 = vperm.xlu0 %1095, %v495_v6   ;;  %v398_v12 = vpack.c.bf16 %v392_v11, %v391_v10  ;;  %v509_v6 = vand.u32 15, %v1322_v3  ;;  %v504_v7 = vadd.s32 128, %v1322_v3 }
  0x27   : > { %v401_v13 = vunpack.c.l.b16 %v397_v9  ;;  %v402_v14 = vunpack.c.h.b16 %v397_v9  ;;  %747 = vperm.xlu1 %1097, %v499_v30  }
  0x28   : > { %v443_v15 = vunpack.c.l.b16 %v398_v12  ;;  %v444_v16 = vunpack.c.h.b16 %v398_v12  ;;  %vm1328_vm3 = vcmp.ge.s32.totalorder %v509_v6, 1  ;;  %v516_v12 = vand.u32 15, %v504_v7 }
  0x29   : > { %v403_v18 = vpack.c.b16 %v401_v13, %v401_v13  ;;  %v404_v19 = vpack.c.b16 %v402_v14, %v402_v14  ;;  %666 = vperm.xlu2 %1096, %v496_v31   ;;  %vm1336_vm6 = vcmp.lt.s32.totalorder %v509_v6, 15 }
  0x2a   : > { %v445_v20 = vpack.c.b16 %v443_v15, %v443_v15  ;;  %v446_v21 = vpack.c.b16 %v444_v16, %v444_v16  ;;  %vm1342_vm7 = vcmp.ge.s32.totalorder %v516_v12, 1  ;;  %vm1359_vm9 = vcmp.lt.s32.totalorder %v516_v12, 15 }
  0x2b   : > { %v411_v22 = vsel %vm409_vm0, %v403_v18, 0  ;;  %v414_v23 = vsel %vm409_vm0, %v404_v19, 0 }
  0x2c   : > { %423 = vmatpush.bf16.msra.mxu0 %v411_v22  ;;  %436 = vmatpush.bf16.msra.mxu1 %v414_v23  ;;  %v448_v24 = vsel %vm409_vm0, %v445_v20, 0  ;;  %v451_v25 = vsel %vm409_vm0, %v446_v21, 0  ;;  %vm858_vm0 = vcmask 58368  }
  0x2d   : > { %460 = vmatpush.bf16.msra.mxu2 %v448_v24  ;;  %473 = vmatpush.bf16.msra.mxu3 %v451_v25 }
  0x2e   : > { %679 = vperm.xlu0 %1095, %v497_v17  }
  0x2f   : > { %1037 = vmatmul.msk.bf16.vlgmr.msra.gmra.mxu0 %vm405_vm1, %v399_v26  ;;  %1038 = vmatmul.msk.bf16.vlgmr.msra.gmra.mxu1 %vm405_vm1, %v399_v26 }
  0x30   : > { %1039 = vmatmul.msk.bf16.vlgmr.msra.gmra.mxu2 %vm405_vm1, %v399_v26  ;;  %1040 = vmatmul.msk.bf16.vlgmr.msra.gmra.mxu3 %vm405_vm1, %v399_v26 }
  0x31   : > { %713 = vperm.xlu2 %1096, %v498_v32  }
  0x36   : > { %777 = vperm.xlu0 %1095, %v500_v27  }
  0x7b   : > { %v1291_v54 = vpop.permute.xlu2 %562 }
  0x83   : > { %v1297_v55 = vpop.permute.xlu2 %666 }
  0x8b   : > { %v1311_v58 = vpop.permute.xlu2 %713 }
  0x90   : > { %v483_v33 = vpop.permute.xlu0 %482 }
  0x91   : > { %v1314_v60 = vpop.permute.xlu1 %592 }
  0x98   : > { %v1256_v34 = vpop.permute.xlu0 %632 }
  0x99   : > { %v1316_v62 = vpop.permute.xlu1 %747 }
  0xa0   : > { %v1258_v41 = vpop.permute.xlu0 %679 }
  0xa8   : > { %v1318_v63 = vpop.permute.xlu0 %777 }
  0xac   : > { %v425_v35 = vpop.f32.mrf.mxu0  ;;  %v438_v36 = vpop.f32.mrf.mxu1 }
  0xad   : > { %v485_v37 = vadd.f32 %v483_v33, %v425_v35  ;;  %v486_v38 = vadd.f32 %v483_v33, %v438_v36 }
  0xaf   : > { %v489_v39 = vmax.f32 %v485_v37, 0.0  ;;  %v490_v40 = vmax.f32 %v486_v38, 0.0 }
  0xb1   : > { %535 = vrot.lane.b32.xlu1 %v490_v40, %s1141_s15  ;;  %603 = vrot.lane.b32.xlu2 %v489_v39, %s1142_s16  ;;  %v1263_v42 = vmul.f32 %v1258_v41, %v489_v39  ;;  %v1266_v43 = vmul.f32 %v1258_v41, %v490_v40 }
  0xb2   : > { %533 = vrot.lane.b32.xlu0 %v489_v39, %s1141_s15 }
  0xb3   : > { %v462_v44 = vpop.f32.mrf.mxu2  ;;  %v475_v45 = vpop.f32.mrf.mxu3 }
  0xb4   : > { %v440_v46 = vpop.f32.mrf.mxu1  ;;  %v427_v47 = vpop.f32.mrf.mxu0  ;;  %v488_v50 = vadd.f32 %v483_v33, %v475_v45  ;;  %v487_v52 = vadd.f32 %v483_v33, %v462_v44 }
  0xb6   : > { %v1274_v51 = vmax.f32 %v488_v50, 0.0  ;;  %v1279_v53 = vmax.f32 %v487_v52, 0.0 }
  0xb9   : > { %575 = vrot.lane.b32.xlu1 %v490_v40, %s1143_s17  ;;  %645 = vrot.lane.b32.xlu2 %v490_v40, %s1144_s18 }
  0xba   : > { %573 = vrot.lane.b32.xlu0 %v489_v39, %s1143_s17 }
  0xbb   : > { %v464_v48 = vpop.f32.mrf.mxu2  ;;  %v477_v49 = vpop.f32.mrf.mxu3 }
  0xc1   : > { %643 = vrot.lane.b32.xlu1 %v489_v39, %s1144_s18  ;;  %692 = vrot.lane.b32.xlu2 %v490_v40, %s1145_s24 }
  0xc2   : > { %605 = vrot.lane.b32.xlu0 %v490_v40, %s1142_s16 }
  0xc9   : > { %690 = vrot.lane.b32.xlu1 %v489_v39, %s1145_s24  ;;  %758 = vrot.lane.b32.xlu2 %v489_v39, %s1146_s25 }
  0xca   : > { %724 = vrot.lane.b32.xlu0 %v489_v39, %s1147_s26 }
  0xd1   : > { %726 = vrot.lane.b32.xlu1 %v490_v40, %s1147_s26  ;;  %790 = vrot.lane.b32.xlu2 %v490_v40, %s1148_s27 }
  0xd2   : > { %760 = vrot.lane.b32.xlu0 %v490_v40, %s1146_s25 }
  0xd9   : > { %788 = vrot.lane.b32.xlu1 %v489_v39, %s1148_s27  ;;  %539 = vrot.lane.b32.xlu2 %v1274_v51, %s1141_s15 }
  0xda   : > { %579 = vrot.lane.b32.xlu0 %v1274_v51, %s1143_s17 }
  0xe1   : > { %537 = vrot.lane.b32.xlu1 %v1279_v53, %s1141_s15  ;;  %577 = vrot.lane.b32.xlu2 %v1279_v53, %s1143_s17 }
  0xe2   : > { %647 = vrot.lane.b32.xlu0 %v1279_v53, %s1144_s18 }
  0xe9   : > { %607 = vrot.lane.b32.xlu1 %v1279_v53, %s1142_s16  ;;  %609 = vrot.lane.b32.xlu2 %v1274_v51, %s1142_s16 }
  0xea   : > { %694 = vrot.lane.b32.xlu0 %v1279_v53, %s1145_s24 }
  0xf1   : > { %649 = vrot.lane.b32.xlu1 %v1274_v51, %s1144_s18  ;;  %728 = vrot.lane.b32.xlu2 %v1279_v53, %s1147_s26 }
  0xf2   : > { %730 = vrot.lane.b32.xlu0 %v1274_v51, %s1147_s26 }
  0xf9   : > { %696 = vrot.lane.b32.xlu1 %v1274_v51, %s1145_s24  ;;  %764 = vrot.lane.b32.xlu2 %v1274_v51, %s1146_s25 }
  0xfa   : > { %792 = vrot.lane.b32.xlu0 %v1279_v53, %s1148_s27 }
 0x101   : > { %762 = vrot.lane.b32.xlu1 %v1279_v53, %s1146_s25  ;;  %811 = vperm.xlu2 %1096, %v501_v56  }
 0x102   : > { %825 = vperm.xlu0 %1095, %v822_v57  }
 0x109   : > { %794 = vrot.lane.b32.xlu1 %v1274_v51, %s1148_s27 }
 0x10b   : > { %v604_v59 = vpop.permute.xlu2 %603 }
 0x10c   : > { %v618_v16 = vsel %vm611_vm5, 0.0, %v604_v59 }
 0x10d   : > { %v626_v23 = vsel %vm1336_vm6, %v618_v16, 0.0 }
 0x10e   : > { %v635_v28 = vmul.f32 %v1256_v34, %v626_v23 }
 0x113   : > { %v646_v61 = vpop.permute.xlu2 %645 }
 0x11b   : > { %v1320_v0 = vpop.permute.xlu2 %692 }
 0x123   : > { %v536_v2 = vpop.permute.xlu1 %535  ;;  %v1324_v5 = vpop.permute.xlu2 %758 }
 0x124   : > { %v534_v4 = vpop.permute.xlu0 %533 }
 0x125   : > { %v548_v9 = vsel %vm541_vm2, 0.0, %v534_v4  ;;  %v542_v19 = vsel %vm541_vm2, %v534_v4, %v536_v2 }
 0x126   : > { %v556_v13 = vsel %vm1328_vm3, %v548_v9, 0.0  ;;  %v557_v24 = vsel %vm1342_vm7, %v542_v19, 0.0 }
 0x127   : > { %v565_v20 = vmul.f32 %v1291_v54, %v556_v13  ;;  %v566_v33 = vmul.f32 %v1291_v54, %v557_v24 }
 0x12b   : > { %v576_v10 = vpop.permute.xlu1 %575  ;;  %v1348_v21 = vpop.permute.xlu2 %790 }
 0x12c   : > { %v574_v11 = vpop.permute.xlu0 %573 }
 0x12d   : > { %v588_v14 = vsel %vm581_vm4, 0.0, %v574_v11  ;;  %v582_v22 = vsel %vm581_vm4, %v574_v11, %v576_v10 }
 0x12e   : > { %v595_v17 = vmul.f32 %v1314_v60, %v588_v14  ;;  %v596_v26 = vmul.f32 %v1314_v60, %v582_v22 }
 0x130   : > { %v599_v25 = vadd.f32 %v595_v17, %v565_v20  ;;  %v600_v44 = vadd.f32 %v596_v26, %v566_v33 }
 0x132   : > { %v639_v37 = vadd.f32 %v635_v28, %v599_v25  ;;  %v803_v28 = vsel %vm796_vm12, %v1348_v21, 0.0 }
 0x133   : > { %v644_v27 = vpop.permute.xlu1 %643  ;;  %v540_v49 = vpop.permute.xlu2 %539 }
 0x134   : > { %v652_v29 = vsel %vm651_vm8, %v644_v27, %v646_v61  ;;  %v658_v30 = vsel %vm651_vm8, 0.0, %v644_v27  ;;  %v606_v31 = vpop.permute.xlu0 %605 }
 0x135   : > { %v660_v35 = vsel %vm1328_vm3, %v658_v30, 0.0  ;;  %v612_v36 = vsel %vm611_vm5, %v604_v59, %v606_v31  ;;  %v661_v38 = vsel %vm1342_vm7, %v652_v29, 0.0 }
 0x136   : > { %v669_v39 = vmul.f32 %v1297_v55, %v660_v35  ;;  %v627_v40 = vsel %vm1359_vm9, %v612_v36, 0.0  ;;  %v670_v47 = vmul.f32 %v1297_v55, %v661_v38 }
 0x137   : > { %v636_v45 = vmul.f32 %v1256_v34, %v627_v40 }
 0x138   : > { %v673_v46 = vadd.f32 %v669_v39, %v639_v37 }
 0x139   : > { %v640_v48 = vadd.f32 %v636_v45, %v600_v44  ;;  %v806_v44 = vsel %vm1359_vm9, %v803_v28, 0.0 }
 0x13a   : > { %v686_v50 = vadd.f32 %v1263_v42, %v673_v46  ;;  %v705_v42 = vsel %vm698_vm10, %v1320_v0, 0.0 }
 0x13b   : > { %v674_v52 = vadd.f32 %v670_v47, %v640_v48  ;;  %v691_v56 = vpop.permute.xlu1 %690  ;;  %v578_v1 = vpop.permute.xlu2 %577 }
 0x13c   : > { %v725_v57 = vpop.permute.xlu0 %724  ;;  %v699_v14 = vsel %vm698_vm10, %v691_v56, %v1320_v0  ;;  %v589_v29 = vsel %vm581_vm4, 0.0, %v578_v1 }
 0x13d   : > { %v687_v59 = vadd.f32 %v1266_v43, %v674_v52  ;;  %v708_v43 = vsel %vm1359_vm9, %v705_v42, 0.0  ;;  %v707_v25 = vsel %vm1336_vm6, %v699_v14, 0.0  ;;  %v597_v45 = vmul.f32 %v1314_v60, %v589_v29 }
 0x13e   : > { %v717_v24 = vmul.f32 %v1311_v58, %v708_v43  ;;  %v716_v37 = vmul.f32 %v1311_v58, %v707_v25 }
 0x143   : > { %v727_v61 = vpop.permute.xlu1 %726  ;;  %v610_v7 = vpop.permute.xlu2 %609 }
 0x144   : > { %v761_v2 = vpop.permute.xlu0 %760  ;;  %v733_v20 = vsel %vm732_vm11, %v725_v57, %v727_v61  ;;  %v739_v22 = vsel %vm732_vm11, %v727_v61, 0.0 }
 0x145   : > { %v741_v33 = vsel %vm1328_vm3, %v733_v20, 0.0  ;;  %v742_v35 = vsel %vm1342_vm7, %v739_v22, 0.0  ;;  %v767_v52 = vsel %vm766_vm13, %v1324_v5, %v761_v2 }
 0x146   : > { %v750_v48 = vmul.f32 %v1316_v62, %v741_v33 }
 0x14b   : > { %v789_v4 = vpop.permute.xlu1 %788  ;;  %v1376_v11 = vpop.permute.xlu2 %728 }
 0x14c   : > { %v580_v6 = vpop.permute.xlu0 %579 }
 0x14d   : > { %v583_v38 = vsel %vm581_vm4, %v578_v1, %v580_v6 }
 0x14e   : > { %v598_v57 = vmul.f32 %v1314_v60, %v583_v38 }
 0x153   : > { %v538_v9 = vpop.permute.xlu1 %537  ;;  %v1386_v19 = vpop.permute.xlu2 %764 }
 0x154   : > { %v648_v10 = vpop.permute.xlu0 %647  ;;  %v543_v16 = vsel %vm541_vm2, %v538_v9, %v540_v49  ;;  %v549_v17 = vsel %vm541_vm2, 0.0, %v538_v9  ;;  %v751_v49 = vmul.f32 %v1316_v62, %v742_v35  ;;  %v773_v9 = vsel %vm766_vm13, %v761_v2, 0.0 }
 0x155   : > { %v558_v30 = vsel %vm1328_vm3, %v549_v17, 0.0  ;;  %v559_v31 = vsel %vm1342_vm7, %v543_v16, 0.0  ;;  %v659_v61 = vsel %vm651_vm8, 0.0, %v648_v10  ;;  %v781_v22 = vmul.f32 %v1318_v63, %v773_v9 }
 0x156   : > { %v567_v46 = vmul.f32 %v1291_v54, %v558_v30  ;;  %v568_v47 = vmul.f32 %v1291_v54, %v559_v31  ;;  %v721_v54 = vadd.f32 %v717_v24, %v687_v59 }
 0x158   : > { %v601_v5 = vadd.f32 %v597_v45, %v567_v46  ;;  %v602_v43 = vadd.f32 %v598_v57, %v568_v47  ;;  %v755_v20 = vadd.f32 %v751_v49, %v721_v54 }
 0x15a   : > { %v785_v29 = vadd.f32 %v781_v22, %v755_v20 }
 0x15b   : > { %v608_v12 = vpop.permute.xlu1 %607  ;;  %v812_v14 = vpop.permute.xlu2 %811 }
 0x15c   : > { %v695_v13 = vpop.permute.xlu0 %694  ;;  %v613_v26 = vsel %vm611_vm5, %v608_v12, %v610_v7  ;;  %v619_v0 = vsel %vm611_vm5, 0.0, %v608_v12  ;;  %v720_v7 = vadd.f32 %v716_v37, %v686_v50  ;;  %v797_v12 = vsel %vm796_vm12, %v789_v4, %v1348_v21 }
 0x15d   : > { %v628_v39 = vsel %vm1336_vm6, %v619_v0, 0.0  ;;  %v629_v40 = vsel %vm1359_vm9, %v613_v26, 0.0  ;;  %v662_v50 = vsel %vm1328_vm3, %v659_v61, 0.0  ;;  %v805_v59 = vsel %vm1336_vm6, %v797_v12, 0.0 }
 0x15e   : > { %v637_v1 = vmul.f32 %v1256_v34, %v628_v39  ;;  %v638_v6 = vmul.f32 %v1256_v34, %v629_v40  ;;  %v754_v17 = vadd.f32 %v750_v48, %v720_v7  ;;  %v780_v34 = vmul.f32 %v1318_v63, %v767_v52 }
 0x15f   : > { %v815_v24 = vmul.f32 %v812_v14, %v806_v44  ;;  %v671_v26 = vmul.f32 %v1297_v55, %v662_v50  ;;  %v684_v39 = vmul.f32 %v1258_v41, %v1279_v53  ;;  %v1149_v50 = vmov 256.0  }
 0x160   : > { %v641_v21 = vadd.f32 %v637_v1, %v601_v5  ;;  %v642_v2 = vadd.f32 %v638_v6, %v602_v43  ;;  %v784_v28 = vadd.f32 %v780_v34, %v754_v17  ;;  %1098 = vrcp.f32 %v1149_v50 }
 0x161   : > { %v819_v37 = vadd.f32 %v815_v24, %v785_v29 }
 0x162   : > { %v675_v31 = vadd.f32 %v671_v26, %v641_v21 }
 0x163   : > { %v650_v23 = vpop.permute.xlu1 %649 }
 0x164   : > { %v731_v27 = vpop.permute.xlu0 %730  ;;  %v653_v36 = vsel %vm651_vm8, %v648_v10, %v650_v23  ;;  %v814_v23 = vmul.f32 %v812_v14, %v805_v59  ;;  %v688_v48 = vadd.f32 %v684_v39, %v675_v31 }
 0x165   : > { %v663_v56 = vsel %vm1342_vm7, %v653_v36, 0.0  ;;  %v740_v33 = vsel %vm732_vm11, %v731_v27, 0.0 }
 0x166   : > { %v672_v16 = vmul.f32 %v1297_v55, %v663_v56  ;;  %v818_v38 = vadd.f32 %v814_v23, %v784_v28  ;;  %v734_v55 = vsel %vm732_vm11, %v1376_v11, %v731_v27  ;;  %v744_v46 = vsel %vm1342_vm7, %v740_v33, 0.0  ;;  %v1099_v15 = vpop.eup %1098 }
 0x167   : > { %v743_v52 = vsel %vm1328_vm3, %v734_v55, 0.0  ;;  %v843_v59 = vmul.f32 256.0, %v1099_v15  ;;  %vm847_vm14 = vweird.f32 %v1099_v15 }
 0x168   : > { %v676_v0 = vadd.f32 %v672_v16, %v642_v2  ;;  %v752_v57 = vmul.f32 %v1316_v62, %v743_v52 }
 0x169   : > { %v844_v32 = vsub.f32 1.0, %v843_v59 }
 0x16b   : > { %v697_v42 = vpop.permute.xlu1 %696  ;;  %v845_v21 = vmul.f32 %v1099_v15, %v844_v32 }
 0x16c   : > { %v706_v60 = vsel %vm698_vm10, %v697_v42, 0.0  ;;  %v793_v10 = vpop.permute.xlu0 %792  ;;  %v700_v4 = vsel %vm698_vm10, %v695_v13, %v697_v42  ;;  %v685_v13 = vmul.f32 %v1258_v41, %v1274_v51  ;;  %v753_v41 = vmul.f32 %v1316_v62, %v744_v46 }
 0x16d   : > { %v710_v25 = vsel %vm1359_vm9, %v706_v60, 0.0  ;;  %v709_v30 = vsel %vm1336_vm6, %v700_v4, 0.0  ;;  %v846_v2 = vadd.f32 %v1099_v15, %v845_v21 }
 0x16e   : > { %v719_v35 = vmul.f32 %v1311_v58, %v710_v25  ;;  %v689_v40 = vadd.f32 %v685_v13, %v676_v0  ;;  %v718_v44 = vmul.f32 %v1311_v58, %v709_v30  ;;  %v774_v58 = vsel %vm766_vm13, %v1386_v19, 0.0 }
 0x16f   : > { %v783_v6 = vmul.f32 %v1318_v63, %v774_v58 }
 0x170   : > { %v723_v49 = vadd.f32 %v719_v35, %v689_v40  ;;  %v722_v53 = vadd.f32 %v718_v44, %v688_v48 }
 0x172   : > { %v757_v61 = vadd.f32 %v753_v41, %v723_v49  ;;  %v756_v7 = vadd.f32 %v752_v57, %v722_v53 }
 0x173   : > { %v763_v36 = vpop.permute.xlu1 %762 }
 0x174   : > { %v826_v45 = vpop.permute.xlu0 %825  ;;  %v768_v11 = vsel %vm766_vm13, %v763_v36, %v1386_v19  ;;  %v787_v62 = vadd.f32 %v783_v6, %v757_v61 }
 0x175   : > { %v828_v47 = vadd.f32 %v826_v45, %v818_v38  ;;  %v829_v51 = vadd.f32 %v826_v45, %v819_v37  ;;  %v782_v1 = vmul.f32 %v1318_v63, %v768_v11 }
 0x177   : > { %v832_v27 = vmax.f32 %v828_v47, 0.0  ;;  %v833_v56 = vmax.f32 %v829_v51, 0.0  ;;  %v786_v42 = vadd.f32 %v782_v1, %v756_v7 }
 0x179   : > { %v836_v18 = vadd.f32 %v833_v56, %v832_v27 }
 0x17b   : > { %837 = vadd.xlane.f32.xlu1 %v836_v18  ;;  %v795_v8 = vpop.permute.xlu1 %794 }
 0x17c   : > { %v798_v54 = vsel %vm796_vm12, %v793_v10, %v795_v8  ;;  %v804_v9 = vsel %vm796_vm12, %v795_v8, 0.0 }
 0x17d   : > { %v807_v12 = vsel %vm1336_vm6, %v798_v54, 0.0  ;;  %v808_v19 = vsel %vm1359_vm9, %v804_v9, 0.0 }
 0x17e   : > { %v816_v5 = vmul.f32 %v812_v14, %v807_v12  ;;  %v817_v43 = vmul.f32 %v812_v14, %v808_v19  ;;  %v848_v14 = vsel %vm847_vm14, %v1099_v15, %v846_v2 }
 0x180   : > { %v820_v16 = vadd.f32 %v816_v5, %v786_v42  ;;  %v821_v60 = vadd.f32 %v817_v43, %v787_v62 }
 0x182   : > { %v830_v17 = vadd.f32 %v826_v45, %v820_v16  ;;  %v831_v63 = vadd.f32 %v826_v45, %v821_v60 }
 0x184   : > { %v834_v20 = vmax.f32 %v830_v17, 0.0  ;;  %v835_v10 = vmax.f32 %v831_v63, 0.0 }
 0x186   : > { %v839_v34 = vadd.f32 %v835_v10, %v834_v20 }
 0x188   : > { %840 = vadd.xlane.f32.xlu2 %v839_v34 }
 0x1ee   : > { %v838_v4 = vpop.xlane.xlu1 %837 }
 0x1ef   : > { %v849_v22 = vmul.f32 %v848_v14, %v838_v4 }
 0x1f1   : > { %v853_v25 = vperm.slane %v849_v22, %v1322_v3 }
 0x1fb   : > { %v841_v23 = vpop.xlane.xlu2 %840 }
 0x1fc   : > { %v850_v24 = vmul.f32 %v848_v14, %v841_v23 }
 0x1fe   : > { %v854_v26 = vperm.slane %v850_v24, %v1322_v3 }
 0x200   : > { %v856_v0 = vsel %vm855_vm15, %v854_v26, %v853_v25 }
 0x201   : > { %859 = vst.msk [vmem:[%s380_s11] sm:$0x3] %vm858_vm0, %v856_v0 }
 0x202 PF: > { %s15_s22 = sadd.s32 1, %s1138_s22   ;;  %s1508_s18 = smov %s1126_s19 }
 0x203   : > { %p12_p10 = scmp.ge.s32.totalorder %s15_s22, 4   ;;  %s1509_s19 = smov %s1215_s28 }
 0x204   : > { %s1510_s20 = smov %s1134_s21  ;;  %s1511_s21 = smov %s1513_s23 }
 0x205   :  { %14 = sbr.rel (!%p12_p10) target bundleno = 3 (0x3), region = 126 }

// kernel: run.8
= control target key start
LH: loop header
LB: loop body
LE: loop exit
PB: predicated region body
PF: predicated region fallthrough
CT: control target
= control target key end

     0   :  { %vm32_vm0 = vcmask 1043456   ;;  %vm28_vm1 = vcmask 64512   ;;  %vm71_vm2 = vcmask 261120   ;;  %vm92_vm3 = vcmask 257024   ;;  %s171_s1 = inlined_call_operand.vmem [shape: bf16[1,8,32], index: 1, kind: input, shape index: {}]   ;;  %s172_s0 = inlined_call_operand.vmem [shape: f32[1,4,8], index: 0, kind: input, shape index: {}]   ;;  %s173_s2 = inlined_call_operand.vmem [shape: f32[1,1,32], index: 2, kind: input, shape index: {}]   ;;  %s174_s4 = inlined_call_operand.vmem [shape: f32[1,32], index: 4, kind: input, shape index: {}]   ;;  %s175_s3 = inlined_call_operand.vmem [shape: bf16[32,32], index: 3, kind: input, shape index: {}]   ;;  %s176_s5 = inlined_call_operand.vmem [shape: f32[4,32], index: 5, kind: output, shape index: {}]  }
   0x1   :  { %v23_v0 = vld [vmem:[%s171_s1] sm:$0xf]  ;;  %v117_v4 = vld [vmem:[%s175_s3 + $0x8] sm:$0xff] }
   0x2   :  { %v21_v1 = vld [vmem:[%s172_s0] sm:$0xf]  ;;  %v34_v2 = vsel %vm32_vm0, %v23_v0, 0  ;;  %81 = vmatpush.bf16.msra.mxu1 %v117_v4 }
   0x3   :  { %v22_v3 = vpack.c.bf16 %v21_v1, %v21_v1  ;;  %43 = vmatpush.bf16.msra.mxu0 %v34_v2  ;;  %v116_v5 = vld [vmem:[%s175_s3] sm:$0xff] }
   0x4   :  { %v118_v6 = vld [vmem:[%s173_s2] ss:$0 sm:$0xff] }
   0x5   :  { %v119_v12 = vld [vmem:[%s174_s4] ss:$0 sm:$0xff] }
   0x6   :  { %106 = vmatmul.msk.bf16.vlgmr.msra.gmra.mxu0 %vm28_vm1, %v22_v3  ;;  %82 = vmatpush.bf16.msra.mxu1 %v116_v5 }
  0x83   :  { %v45_v7 = vpop.f32.mrf.mxu0 }
  0x84   :  { %v46_v8 = vadd.f32 %v118_v6, %v45_v7 }
  0x86   :  { %v49_v9 = vmax.f32 %v46_v8, 0.0 }
  0x88   :  { %v50_v10 = vpack.c.bf16 %v49_v9, %v49_v9 }
  0x8a   :  { %115 = vmatmul.msk.bf16.vlgmr.msra.gmra.mxu1 %vm71_vm2, %v50_v10 }
  0x8b   :  { %v47_v11 = vpop.f32.mrf.mxu0 }
 0x107   :  { %v84_v13 = vpop.f32.mrf.mxu1 }
 0x108   :  { %v85_v14 = vadd.f32 %v119_v12, %v84_v13 }
 0x10a   :  { %93 = vst.msk [vmem:[%s176_s5] sm:$0xf] %vm92_vm3, %v85_v14 }
 0x10f   :  { %v86_v15 = vpop.f32.mrf.mxu1 }

// kernel: run.9
= control target key start
LH: loop header
LB: loop body
LE: loop exit
PB: predicated region body
PF: predicated region fallthrough
CT: control target
= control target key end

     0   :  { %s307_s0 = inlined_call_operand.vmem [shape: f32[4,32], index: 0, kind: input, shape index: {}]   ;;  %s308_s1 = inlined_call_operand.vmem [shape: f32[4,32], index: 1, kind: input, shape index: {}]   ;;  %s309_s2 = inlined_call_operand.vmem [shape: bf16[32,32], index: 2, kind: input, shape index: {}]   ;;  %s310_s3 = inlined_call_operand.vmem [shape: f32[1,32], index: 3, kind: input, shape index: {}, may-alias: {3,5}]   ;;  %s311_s4 = inlined_call_operand.vmem [shape: bf16[32,32], index: 4, kind: input, shape index: {}]   ;;  %s312_s5 = inlined_call_operand.vmem [shape: f32[1,32], index: 5, kind: input, shape index: {}, may-alias: {3,5}]   ;;  %s313_s6 = inlined_call_operand.hbm [shape: f32[1,1], index: 6, kind: output, shape index: {}]  }
   0x1   :  { %v199_v0 = vld [vmem:[%s309_s2 + $0x8] sm:$0xff]  ;;  %v198_v1 = vld [vmem:[%s309_s2] sm:$0xff] }
   0x2   :  { %57 = vmatpush.bf16.msra.mxu0 %v199_v0  ;;  %v25_v2 = vld [vmem:[%s307_s0] sm:$0xf] }
   0x3   :  { %11 = vsyncpa [#allocation3], 0  ;;  %v26_v3 = vpack.c.bf16 %v25_v2, %v25_v2  ;;  %vm47_vm0 = vcmask 261120   ;;  %v201_v4 = vld [vmem:[%s311_s4 + $0x8] sm:$0xff]  ;;  %v200_v5 = vld [vmem:[%s311_s4] sm:$0xff]  ;;  %vm104_vm1 = vcmask 257024  }
   0x4   :  { %95 = vmatpush.bf16.msra.mxu1 %v201_v4  ;;  %v206_v6 = vld [vmem:[%s310_s3] ss:$0 sm:$0xff]  ;;  %vm140_vm8 = vcmask 3072   ;;  %v240_v52 = vmov 4.0   ;;  %s241_s3 = smov [#allocation2]   ;;  %s171_s12 = sshll.u32 %s313_s6, 4  ;;  %s172_s12 = int_to_ptr.hbm [resolvable:$true] %s171_s12 }
   0x5   :  { %v207_v12 = vld [vmem:[%s312_s5] ss:$0 sm:$0xff]  ;;  %s169_s5 = sshll.u32 %s241_s3, 4  ;;  %vm162_vm10 = vcmask 0   ;;  %s170_s5 = int_to_ptr.vmem [resolvable:$true] %s169_s5 }
   0x6   :  { %58 = vmatpush.bf16.msra.mxu0 %v198_v1  ;;  %v102_v16 = vld [vmem:[%s308_s1] sm:$0xf] }
   0x7   :  { %v120_v18 = vmul.f32 %v102_v16, %v102_v16 }
   0x8   :  { %96 = vmatpush.bf16.msra.mxu1 %v200_v5 }
   0x9   :  { %188 = vmatmul.msk.bf16.vlgmr.msra.gmra.mxu0 %vm47_vm0, %v26_v3  ;;  %v121_v20 = vsel %vm104_vm1, %v120_v18, 0.0 }
  0x86   :  { %v60_v7 = vpop.f32.mrf.mxu0 }
  0x87   :  { %v61_v8 = vadd.f32 %v206_v6, %v60_v7 }
  0x89   :  { %v64_v9 = vmax.f32 %v61_v8, 0.0 }
  0x8b   :  { %v65_v10 = vpack.c.bf16 %v64_v9, %v64_v9 }
  0x8d   :  { %197 = vmatmul.msk.bf16.vlgmr.msra.gmra.mxu1 %vm47_vm0, %v65_v10 }
  0x8e   :  { %v62_v11 = vpop.f32.mrf.mxu0 }
 0x10a   :  { %v98_v13 = vpop.f32.mrf.mxu1 }
 0x10b   :  { %v99_v14 = vadd.f32 %v207_v12, %v98_v13 }
 0x10d   :  { %v103_v15 = vmul.f32 %v99_v14, %v99_v14 }
 0x10f   :  { %v105_v17 = vsel %vm104_vm1, %v103_v15, 0.0 }
 0x110   :  { %106 = vadd.xlane.f32.xlu0 %v105_v17 }
 0x112   :  { %v100_v19 = vpop.f32.mrf.mxu1 }
 0x118   :  { %122 = vadd.xlane.f32.xlu0 %v121_v20 }
 0x183   :  { %v107_v21 = vpop.xlane.xlu0 %106 }
 0x184   :  { %v108_v22 = vadd.f32 1e-24, %v107_v21 }
 0x186   :  { %208 = vrsqrt.f32 %v108_v22  ;;  %vm115_vm3 = vweird.f32 %v108_v22 }
 0x18b   :  { %v123_v23 = vpop.xlane.xlu0 %122 }
 0x18c   :  { %v209_v24 = vpop.eup %208  ;;  %v124_v25 = vadd.f32 1e-24, %v123_v23 }
 0x18d   :  { %v110_v26 = vmul.f32 %v209_v24, %v108_v22  ;;  %vm116_vm2 = vweird.f32 %v209_v24 }
 0x18e   :  { %210 = vrsqrt.f32 %v124_v25  ;;  %vm117_vm5 = vmor %vm115_vm3, %vm116_vm2  ;;  %vm131_vm6 = vweird.f32 %v124_v25 }
 0x18f   :  { %v111_v27 = vmul.f32 %v209_v24, %v110_v26  ;;  %212 = vrcp.f32 %v240_v52 }
 0x191   :  { %v112_v28 = vmul.f32 0.5, %v111_v27 }
 0x193   :  { %v113_v30 = vsub.f32 1.5, %v112_v28 }
 0x194   :  { %v211_v29 = vpop.eup %210 }
 0x195   :  { %v126_v31 = vmul.f32 %v211_v29, %v124_v25  ;;  %v114_v34 = vmul.f32 %v209_v24, %v113_v30  ;;  %vm132_vm4 = vweird.f32 %v211_v29  ;;  %v213_v53 = vpop.eup %212 }
 0x196   :  { %vm133_vm7 = vmor %vm131_vm6, %vm132_vm4  ;;  %v153_v54 = vmul.f32 4.0, %v213_v53  ;;  %vm157_vm9 = vweird.f32 %v213_v53 }
 0x197   :  { %v127_v32 = vmul.f32 %v211_v29, %v126_v31  ;;  %v118_v36 = vsel %vm117_vm5, %v209_v24, %v114_v34 }
 0x198   :  { %v119_v39 = vmul.f32 %v118_v36, %v99_v14  ;;  %v154_v55 = vsub.f32 1.0, %v153_v54 }
 0x199   :  { %v128_v33 = vmul.f32 0.5, %v127_v32 }
 0x19a   :  { %v155_v56 = vmul.f32 %v213_v53, %v154_v55 }
 0x19b   :  { %v129_v35 = vsub.f32 1.5, %v128_v33 }
 0x19c   :  { %v156_v57 = vadd.f32 %v213_v53, %v155_v56 }
 0x19d   :  { %v130_v37 = vmul.f32 %v211_v29, %v129_v35 }
 0x19e   :  { %v158_v58 = vsel %vm157_vm9, %v213_v53, %v156_v57 }
 0x19f   :  { %v134_v38 = vsel %vm133_vm7, %v211_v29, %v130_v37 }
 0x1a0   :  { %v135_v40 = vmul.f32 %v134_v38, %v102_v16 }
 0x1a2   :  { %v136_v41 = vmul.f32 %v135_v40, %v119_v39 }
 0x1a4   :  { %v137_v42 = vsel %vm104_vm1, %v136_v41, 0.0 }
 0x1a5   :  { %138 = vadd.xlane.f32.xlu1 %v137_v42 }
 0x218   :  { %v139_v43 = vpop.xlane.xlu1 %138 }
 0x219   :  { %v141_v44 = vsel %vm140_vm8, %v139_v43, 0.0 }
 0x21a   :  { %142 = vadd.xlane.f32.xlu1 %v141_v44 }
 0x28d   :  { %v143_v45 = vpop.xlane.xlu1 %142 }
 0x28e   :  { %v144_v46 = vrot.slane %v143_v45, 4 }
 0x290   :  { %v145_v47 = vadd.f32 %v144_v46, %v143_v45 }
 0x292   :  { %v146_v48 = vrot.slane %v145_v47, 2 }
 0x294   :  { %v147_v49 = vadd.f32 %v146_v48, %v145_v47 }
 0x296   :  { %v148_v50 = vrot.slane %v147_v49, 1 }
 0x298   :  { %v149_v51 = vadd.f32 %v148_v50, %v147_v49 }
 0x29a   :  { %202 = vpush %v149_v51 }
 0x2cb   :  { %s203_s1 = spop %202 }
 0x2cc   :  { %v151_v59 = vstv %s203_s1 }
 0x2cd   :  { %v159_v60 = vmul.f32 %v158_v58, %v151_v59 }
 0x2cf   :  { %v160_v61 = vmul.f32 4.0, %v159_v60 }
 0x2d1   :  { %v161_v62 = vsub.f32 4.0, %v160_v61 }
 0x2d3   :  { %163 = vst.msk [vmem:[#allocation2] sm:$0x1] %vm162_vm10, %v161_v62 }
 0x2d4   :  { %174 = dma.vmem_to_hbm [thread:$0]  %s170_s5, 16, %s172_s12, [#allocation3]  }
 0x2d5   :  { %238 = dma.done.wait [#allocation3], 16  }
 0x2d6   :  { %239 = vsyncadd [#allocation3], 4294967280 }
 0x2d7   :  { %179 = vsyncpa [#allocation3], 1 }

</bundles_post_ra>
